<compile_context>
chip_gen: v7x
topology: tpu7x:2x2x1
jax: 0.10.0
libtpu: 0.0.40
codegen_flags: <defaults>
</compile_context>

<pallas_src>
import functools

import jax
import jax.numpy as jnp
from jax.experimental import pallas as pl
from jax.experimental.pallas import tpu as pltpu

# ---------------- model config (small, self-consistent) ----------------
VOCAB = 100
HIDDEN = 32
NUM_HEADS = 4
HEAD_DIM = HIDDEN // NUM_HEADS
INTERMEDIATE = 64
NUM_LAYERS = 2
MAX_POS = 16
NUM_CLASS = 3
LN_EPS = 1e-12          # BERT default layer-norm eps
PROJ_PAD = 128          # lane-dense padded width of the classifier output
NEG_INF = -1e9
BATCH_BLOCK = 1         # batch elements handled per grid step ("parallel" axis)


def _ln(h, g, b):
    mu = jnp.mean(h, axis=-1, keepdims=True)
    var = jnp.mean((h - mu) ** 2, axis=-1, keepdims=True)
    return (h - mu) * jax.lax.rsqrt(var + LN_EPS) * g + b


def _bf16(x):
    return x.astype(jnp.bfloat16)


# ---------------- fused Pallas kernel: one grid step = one (batch block, layer) ----------------
def _bert_kernel(x_ref, mask_ref,
                 emb_g_ref, emb_b_ref,
                 wqkv_ref, bqkv_ref, wo_ref, bo_ref,
                 ln1g_ref, ln1b_ref,
                 w1_ref, b1_ref, w2_ref, b2_ref,
                 ln2g_ref, ln2b_ref,
                 projw_ref, projb_ref,
                 o_ref, h_ref, *, batch_block, seq):
    layer = pl.program_id(1)
    rows = batch_block * seq

    # first layer step of this batch block: embedding LayerNorm -> VMEM scratch
    @pl.when(layer == 0)
    def _():
        h_ref[...] = _ln(x_ref[...], emb_g_ref[...], emb_b_ref[...])

    x = h_ref[...]                      # (BB*S, H) f32, resident hidden state
    add_mask = mask_ref[...]            # (BB, 1, S) additive key-padding mask (f32)

    # ---- one encoder layer (this grid step's streamed weight block) ----
    # fused QKV projection; 1/sqrt(HEAD_DIM) already folded into the Q columns
    qkv = jnp.dot(_bf16(x), wqkv_ref[0],
                  preferred_element_type=jnp.float32) + bqkv_ref[0]   # (BB*S, 3H)

    wo_l = wo_ref[0]                                                  # (H, H) bf16
    attn = jnp.zeros((rows, HIDDEN), jnp.float32)
    for hd in range(NUM_HEADS):         # static unroll; heads stay in lanes
        q_h = _bf16(qkv[:, hd * HEAD_DIM:(hd + 1) * HEAD_DIM]
                    ).reshape(batch_block, seq, HEAD_DIM)
        k_h = _bf16(qkv[:, HIDDEN + hd * HEAD_DIM:HIDDEN + (hd + 1) * HEAD_DIM]
                    ).reshape(batch_block, seq, HEAD_DIM)
        v_h = _bf16(qkv[:, 2 * HIDDEN + hd * HEAD_DIM:2 * HIDDEN + (hd + 1) * HEAD_DIM]
                    ).reshape(batch_block, seq, HEAD_DIM)

        # batched (over batch block) scores / softmax / context, all per head
        s = jnp.einsum("bqd,bkd->bqk", q_h, k_h,
                       preferred_element_type=jnp.float32) + add_mask
        s = s - jnp.max(s, axis=-1, keepdims=True)
        p = jnp.exp(s)
        p = p * pl.reciprocal(jnp.sum(p, axis=-1, keepdims=True), approx=True)
        ctx = jnp.einsum("bqk,bkd->bqd", _bf16(p), v_h,
                         preferred_element_type=jnp.float32)          # (BB, S, HD)

        # fold the "concat heads back along lanes" into per-head row slices of
        # Wo and accumulate — no lane/sublane concatenations at all.
        attn = attn + jnp.dot(_bf16(ctx.reshape(rows, HEAD_DIM)),
                              wo_l[hd * HEAD_DIM:(hd + 1) * HEAD_DIM, :],
                              preferred_element_type=jnp.float32)

    h1 = _ln(x + attn + bo_ref[0], ln1g_ref[0], ln1b_ref[0])

    # feed-forward
    # TODO(synk): HF BERT uses exact erf GELU; tanh-approx GELU is used here
    # since erf is not guaranteed to lower in Mosaic (difference is tiny).
    f = jnp.dot(_bf16(h1), w1_ref[0], preferred_element_type=jnp.float32) + b1_ref[0]
    f = jax.nn.gelu(f, approximate=True)
    f = jnp.dot(_bf16(f), w2_ref[0], preferred_element_type=jnp.float32) + b2_ref[0]
    x_new = _ln(h1 + f, ln2g_ref[0], ln2b_ref[0])
    h_ref[...] = x_new

    # last layer: classifier over the full (BB*S, H) slab -> lane-dense
    # (BB*S, 128) store; wrapper picks the CLS rows / first NUM_CLASS columns.
    @pl.when(layer == pl.num_programs(1) - 1)
    def _():
        o_ref[...] = (jnp.dot(_bf16(x_new), projw_ref[...],
                              preferred_element_type=jnp.float32) + projb_ref[...])


# ---------------- forward pass (gather glue in JAX, encoder fused) ----------------
def custom_bert_forward(kops, input_ids, attention_mask):
    B, S = input_ids.shape
    BB = BATCH_BLOCK
    assert B % BB == 0 and S % 8 == 0

    # embeddings (tiny table gather is glue; no clean Pallas equivalent needed)
    x = (kops["word_emb"][input_ids]
         + kops["pos_emb"][jnp.arange(S)][None, :, :]
         + kops["type_emb"][0][None, None, :]).astype(jnp.float32)
    x_flat = x.reshape(B * S, HIDDEN)

    # O(B*S) additive key-padding mask (no O(R^2) block-diag mask shipped)
    add_mask = ((1.0 - attention_mask.astype(jnp.float32)) * NEG_INF).reshape(B, 1, S)

    def rep2(arr):      # full 2-D block, same block every grid step
        return pl.BlockSpec(arr.shape, lambda b, l: (0, 0))

    def stream3(arr):   # (L, r, c) stacked per-layer weights, stream layer l
        return pl.BlockSpec((1,) + tuple(arr.shape[1:]), lambda b, l: (l, 0, 0))

    operands = (x_flat, add_mask,
                kops["emb_ln_g"], kops["emb_ln_b"],
                kops["wqkv"], kops["bqkv"], kops["wo"], kops["bo"],
                kops["ln1_g"], kops["ln1_b"],
                kops["w1"], kops["b1"], kops["w2"], kops["b2"],
                kops["ln2_g"], kops["ln2_b"],
                kops["proj_w"], kops["proj_b"])

    in_specs = [
        pl.BlockSpec((BB * S, HIDDEN), lambda b, l: (b, 0)),    # embeddings
        pl.BlockSpec((BB, 1, S), lambda b, l: (b, 0, 0)),       # key-padding mask
        rep2(kops["emb_ln_g"]), rep2(kops["emb_ln_b"]),
        stream3(kops["wqkv"]), stream3(kops["bqkv"]),
        stream3(kops["wo"]), stream3(kops["bo"]),
        stream3(kops["ln1_g"]), stream3(kops["ln1_b"]),
        stream3(kops["w1"]), stream3(kops["b1"]),
        stream3(kops["w2"]), stream3(kops["b2"]),
        stream3(kops["ln2_g"]), stream3(kops["ln2_b"]),
        rep2(kops["proj_w"]), rep2(kops["proj_b"]),
    ]

    out_pad = pl.pallas_call(
        functools.partial(_bert_kernel, batch_block=BB, seq=S),
        out_shape=jax.ShapeDtypeStruct((B * S, PROJ_PAD), jnp.float32),
        grid=(B // BB, NUM_LAYERS),
        in_specs=in_specs,
        out_specs=pl.BlockSpec((BB * S, PROJ_PAD), lambda b, l: (b, 0)),
        scratch_shapes=[pltpu.VMEM((BB * S, HIDDEN), jnp.float32)],
        compiler_params=pltpu.CompilerParams(
            dimension_semantics=("parallel", "arbitrary"),
            vmem_limit_bytes=32 * 1024 * 1024),
    )(*operands)

    # CLS row of every batch element, first NUM_CLASS lanes
    return out_pad.reshape(B, S, PROJ_PAD)[:, 0, :NUM_CLASS]


# ---------------- parameter init (deterministic, synthetic) ----------------
def init_params(key):
    def nrm(k, shape):
        return (0.02 * jax.random.normal(k, shape)).astype(jnp.float32)

    keys = iter(jax.random.split(key, 64))
    params = {
        "word_emb": nrm(next(keys), (VOCAB, HIDDEN)),
        "pos_emb": nrm(next(keys), (MAX_POS, HIDDEN)),
        "type_emb": nrm(next(keys), (2, HIDDEN)),
        "emb_ln_g": jnp.ones((1, HIDDEN), jnp.float32),
        "emb_ln_b": nrm(next(keys), (1, HIDDEN)),
        "proj_w": nrm(next(keys), (HIDDEN, NUM_CLASS)),
        "proj_b": nrm(next(keys), (1, NUM_CLASS)),
    }

    wqkv, bqkv, wo, bo = [], [], [], []
    w1, b1, w2, b2 = [], [], [], []
    ln1b, ln2b = [], []
    for _ in range(NUM_LAYERS):
        wq_ = nrm(next(keys), (HIDDEN, HIDDEN))
        wk_ = nrm(next(keys), (HIDDEN, HIDDEN))
        wv_ = nrm(next(keys), (HIDDEN, HIDDEN))
        wqkv.append(jnp.concatenate([wq_, wk_, wv_], axis=1))
        bqkv.append(nrm(next(keys), (1, 3 * HIDDEN)))
        wo.append(nrm(next(keys), (HIDDEN, HIDDEN)))
        bo.append(nrm(next(keys), (1, HIDDEN)))
        w1.append(nrm(next(keys), (HIDDEN, INTERMEDIATE)))
        b1.append(nrm(next(keys), (1, INTERMEDIATE)))
        w2.append(nrm(next(keys), (INTERMEDIATE, HIDDEN)))
        b2.append(nrm(next(keys), (1, HIDDEN)))
        ln1b.append(nrm(next(keys), (1, HIDDEN)))
        ln2b.append(nrm(next(keys), (1, HIDDEN)))

    params["wqkv"] = jnp.stack(wqkv)                                  # (L, H, 3H)
    params["bqkv"] = jnp.stack(bqkv)                                  # (L, 1, 3H)
    params["wo"] = jnp.stack(wo)                                      # (L, H, H)
    params["bo"] = jnp.stack(bo)                                      # (L, 1, H)
    params["ln1_g"] = jnp.ones((NUM_LAYERS, 1, HIDDEN), jnp.float32)
    params["ln1_b"] = jnp.stack(ln1b)
    params["w1"] = jnp.stack(w1)                                      # (L, H, I)
    params["b1"] = jnp.stack(b1)                                      # (L, 1, I)
    params["w2"] = jnp.stack(w2)                                      # (L, I, H)
    params["b2"] = jnp.stack(b2)                                      # (L, 1, H)
    params["ln2_g"] = jnp.ones((NUM_LAYERS, 1, HIDDEN), jnp.float32)
    params["ln2_b"] = jnp.stack(ln2b)
    return params


def prepare_kernel_operands(params):
    """One-time transform of the frozen params into kernel-ready operands:
    fold 1/sqrt(HEAD_DIM) into the Q columns, pad the classifier to 128 lanes,
    and cast the matmul weights to bf16 (halves weight DMA / VMEM residency)."""
    scale = 1.0 / (HEAD_DIM ** 0.5)
    wqkv = params["wqkv"].at[:, :, :HIDDEN].multiply(scale)
    bqkv = params["bqkv"].at[:, :, :HIDDEN].multiply(scale)
    proj_w = jnp.zeros((HIDDEN, PROJ_PAD), jnp.float32).at[:, :NUM_CLASS].set(params["proj_w"])
    proj_b = jnp.zeros((1, PROJ_PAD), jnp.float32).at[:, :NUM_CLASS].set(params["proj_b"])
    return {
        "word_emb": params["word_emb"], "pos_emb": params["pos_emb"],
        "type_emb": params["type_emb"],
        "emb_ln_g": params["emb_ln_g"], "emb_ln_b": params["emb_ln_b"],
        "wqkv": _bf16(wqkv), "bqkv": bqkv,
        "wo": _bf16(params["wo"]), "bo": params["bo"],
        "ln1_g": params["ln1_g"], "ln1_b": params["ln1_b"],
        "w1": _bf16(params["w1"]), "b1": params["b1"],
        "w2": _bf16(params["w2"]), "b2": params["b2"],
        "ln2_g": params["ln2_g"], "ln2_b": params["ln2_b"],
        "proj_w": _bf16(proj_w), "proj_b": proj_b,
    }


# ---------------- pure-JAX f32 reference for a sanity check ----------------
def reference_forward(params, input_ids, attention_mask):
    B, S = input_ids.shape
    x = (params["word_emb"][input_ids]
         + params["pos_emb"][jnp.arange(S)][None, :, :]
         + params["type_emb"][0][None, None, :])
    x = _ln(x, params["emb_ln_g"], params["emb_ln_b"])
    add_mask = ((1.0 - attention_mask.astype(jnp.float32)) * NEG_INF)[:, None, None, :]
    for l in range(NUM_LAYERS):
        qkv = x @ params["wqkv"][l] + params["bqkv"][l]
        q, k, v = jnp.split(qkv, 3, axis=-1)

        def heads(t):
            return t.reshape(B, S, NUM_HEADS, HEAD_DIM).transpose(0, 2, 1, 3)

        q, k, v = heads(q), heads(k), heads(v)
        s = jnp.einsum("bhqd,bhkd->bhqk", q, k) / (HEAD_DIM ** 0.5) + add_mask
        p = jax.nn.softmax(s, axis=-1)
        ctx = jnp.einsum("bhqk,bhkd->bhqd", p, v).transpose(0, 2, 1, 3).reshape(B, S, HIDDEN)
        h1 = _ln(x + ctx @ params["wo"][l] + params["bo"][l],
                 params["ln1_g"][l], params["ln1_b"][l])
        f = jax.nn.gelu(h1 @ params["w1"][l] + params["b1"][l], approximate=True)
        f = f @ params["w2"][l] + params["b2"][l]
        x = _ln(h1 + f, params["ln2_g"][l], params["ln2_b"][l])
    cls = x[:, 0, :]
    return cls @ params["proj_w"] + params["proj_b"]


if __name__ == "__main__":
    key = jax.random.PRNGKey(0)
    kp, kid = jax.random.split(key)
    params = init_params(kp)
    kops = prepare_kernel_operands(params)   # one-time weight transform

    B, S = 2, 8
    input_ids = jax.random.randint(kid, (B, S), 0, VOCAB, dtype=jnp.int32)
    attention_mask = jnp.array(
        [[1, 1, 1, 1, 1, 1, 1, 1],
         [1, 1, 1, 1, 1, 0, 0, 0]], dtype=jnp.int32)

    fwd = jax.jit(custom_bert_forward)
    out = jax.block_until_ready(fwd(kops, input_ids, attention_mask))
    assert out.shape == (B, NUM_CLASS)

    # reference is pure f32; kernel uses bf16 matmul operands + approx reciprocal,
    # so allow a generous (but still meaningful) tolerance.
    ref = reference_forward(params, input_ids, attention_mask)
    assert jnp.allclose(out, ref, atol=2e-2, rtol=2e-2), (out, ref)

    print("KERNEL_OK")
</pallas_src>

<mosaic_0001>
module attributes {stable_mosaic.version = 11 : i64} {
  func.func @_bert_kernel(%arg0: i32, %arg1: i32, %arg2: memref<8x32xf32, #tpu.memory_space<vmem>>, %arg3: memref<1x1x8xf32, #tpu.memory_space<vmem>>, %arg4: memref<1x32xf32, #tpu.memory_space<vmem>>, %arg5: memref<1x32xf32, #tpu.memory_space<vmem>>, %arg6: memref<1x32x96xbf16, #tpu.memory_space<vmem>>, %arg7: memref<1x1x96xf32, #tpu.memory_space<vmem>>, %arg8: memref<1x32x32xbf16, #tpu.memory_space<vmem>>, %arg9: memref<1x1x32xf32, #tpu.memory_space<vmem>>, %arg10: memref<1x1x32xf32, #tpu.memory_space<vmem>>, %arg11: memref<1x1x32xf32, #tpu.memory_space<vmem>>, %arg12: memref<1x32x64xbf16, #tpu.memory_space<vmem>>, %arg13: memref<1x1x64xf32, #tpu.memory_space<vmem>>, %arg14: memref<1x64x32xbf16, #tpu.memory_space<vmem>>, %arg15: memref<1x1x32xf32, #tpu.memory_space<vmem>>, %arg16: memref<1x1x32xf32, #tpu.memory_space<vmem>>, %arg17: memref<1x1x32xf32, #tpu.memory_space<vmem>>, %arg18: memref<32x128xbf16, #tpu.memory_space<vmem>>, %arg19: memref<1x128xf32, #tpu.memory_space<vmem>>, %arg20: memref<8x128xf32, #tpu.memory_space<vmem>>, %arg21: memref<8x32xf32, #tpu.memory_space<vmem>>) attributes {dimension_semantics = [#tpu.dimension_semantics<parallel>, #tpu.dimension_semantics<arbitrary>], iteration_bounds = array<i64: 2, 2>, scalar_prefetch = 0 : i64, scratch_operands = 1 : i64, tpu.core_type = #tpu.core_type<tc>, window_params = [{transform_indices = @transform_0, window_bounds = array<i64: 8, 32>}, {transform_indices = @transform_1, window_bounds = array<i64: 1, 1, 8>}, {pipeline_mode = #tpu.pipeline_mode<synchronous>, transform_indices = @transform_2, window_bounds = array<i64: 1, 32>}, {pipeline_mode = #tpu.pipeline_mode<synchronous>, transform_indices = @transform_3, window_bounds = array<i64: 1, 32>}, {transform_indices = @transform_4, window_bounds = array<i64: 1, 32, 96>}, {transform_indices = @transform_5, window_bounds = array<i64: 1, 1, 96>}, {transform_indices = @transform_6, window_bounds = array<i64: 1, 32, 32>}, {transform_indices = @transform_7, window_bounds = array<i64: 1, 1, 32>}, {transform_indices = @transform_8, window_bounds = array<i64: 1, 1, 32>}, {transform_indices = @transform_9, window_bounds = array<i64: 1, 1, 32>}, {transform_indices = @transform_10, window_bounds = array<i64: 1, 32, 64>}, {transform_indices = @transform_11, window_bounds = array<i64: 1, 1, 64>}, {transform_indices = @transform_12, window_bounds = array<i64: 1, 64, 32>}, {transform_indices = @transform_13, window_bounds = array<i64: 1, 1, 32>}, {transform_indices = @transform_14, window_bounds = array<i64: 1, 1, 32>}, {transform_indices = @transform_15, window_bounds = array<i64: 1, 1, 32>}, {pipeline_mode = #tpu.pipeline_mode<synchronous>, transform_indices = @transform_16, window_bounds = array<i64: 32, 128>}, {pipeline_mode = #tpu.pipeline_mode<synchronous>, transform_indices = @transform_17, window_bounds = array<i64: 1, 128>}, {transform_indices = @transform_18, window_bounds = array<i64: 8, 128>}]} {
    %c0_i32 = arith.constant 0 : i32
    %0 = arith.cmpi eq, %arg1, %c0_i32 : i32
    %1 = arith.extui %0 : i1 to i32
    %c0_i32_0 = arith.constant 0 : i32
    %2 = arith.cmpi ne, %1, %c0_i32_0 : i32
    scf.if %2 {
      %c0_81 = arith.constant 0 : index
      %c0_82 = arith.constant 0 : index
      %223 = vector.load %arg2[%c0_81, %c0_82] : memref<8x32xf32, #tpu.memory_space<vmem>>, vector<8x32xf32>
      %c0_83 = arith.constant 0 : index
      %c0_84 = arith.constant 0 : index
      %224 = vector.load %arg4[%c0_83, %c0_84] : memref<1x32xf32, #tpu.memory_space<vmem>>, vector<1x32xf32>
      %c0_85 = arith.constant 0 : index
      %c0_86 = arith.constant 0 : index
      %225 = vector.load %arg5[%c0_85, %c0_86] : memref<1x32xf32, #tpu.memory_space<vmem>>, vector<1x32xf32>
      %cst_87 = arith.constant dense<0.000000e+00> : vector<8xf32>
      %226 = vector.multi_reduction <add>, %223, %cst_87 [1] : vector<8x32xf32> to vector<8xf32>
      %227 = vector.shape_cast %226 : vector<8xf32> to vector<8x1xf32>
      %cst_88 = arith.constant 3.200000e+01 : f32
      %228 = vector.broadcast %cst_88 : f32 to vector<8x1xf32>
      %229 = arith.divf %227, %228 : vector<8x1xf32>
      %230 = vector.broadcast %229 : vector<8x1xf32> to vector<8x32xf32>
      %231 = arith.subf %223, %230 : vector<8x32xf32>
      %232 = arith.mulf %231, %231 : vector<8x32xf32>
      %cst_89 = arith.constant dense<0.000000e+00> : vector<8xf32>
      %233 = vector.multi_reduction <add>, %232, %cst_89 [1] : vector<8x32xf32> to vector<8xf32>
      %234 = vector.shape_cast %233 : vector<8xf32> to vector<8x1xf32>
      %cst_90 = arith.constant 3.200000e+01 : f32
      %235 = vector.broadcast %cst_90 : f32 to vector<8x1xf32>
      %236 = arith.divf %234, %235 : vector<8x1xf32>
      %237 = vector.broadcast %229 : vector<8x1xf32> to vector<8x32xf32>
      %238 = arith.subf %223, %237 : vector<8x32xf32>
      %cst_91 = arith.constant 9.99999996E-13 : f32
      %239 = vector.broadcast %cst_91 : f32 to vector<8x1xf32>
      %240 = arith.addf %236, %239 : vector<8x1xf32>
      %241 = math.rsqrt %240 : vector<8x1xf32>
      %242 = vector.broadcast %241 : vector<8x1xf32> to vector<8x32xf32>
      %243 = arith.mulf %238, %242 : vector<8x32xf32>
      %244 = vector.broadcast %224 : vector<1x32xf32> to vector<8x32xf32>
      %245 = arith.mulf %243, %244 : vector<8x32xf32>
      %246 = vector.broadcast %225 : vector<1x32xf32> to vector<8x32xf32>
      %247 = arith.addf %245, %246 : vector<8x32xf32>
      %c0_92 = arith.constant 0 : index
      %c0_93 = arith.constant 0 : index
      %248 = vector.load %arg21[%c0_92, %c0_93] : memref<8x32xf32, #tpu.memory_space<vmem>>, vector<8x32xf32>
      tpu.vector_store %arg21[%c0_92, %c0_93], %247 {strides = array<i32>} : memref<8x32xf32, #tpu.memory_space<vmem>>, vector<8x32xf32>,
    } else {
    }
    %c0 = arith.constant 0 : index
    %c0_1 = arith.constant 0 : index
    %3 = vector.load %arg21[%c0, %c0_1] : memref<8x32xf32, #tpu.memory_space<vmem>>, vector<8x32xf32>
    %c0_2 = arith.constant 0 : index
    %c0_3 = arith.constant 0 : index
    %c0_4 = arith.constant 0 : index
    %4 = vector.load %arg3[%c0_2, %c0_3, %c0_4] : memref<1x1x8xf32, #tpu.memory_space<vmem>>, vector<1x1x8xf32>
    %5 = arith.truncf %3 : vector<8x32xf32> to vector<8x32xbf16>
    %c0_5 = arith.constant 0 : index
    %c0_6 = arith.constant 0 : index
    %c0_7 = arith.constant 0 : index
    %6 = vector.load %arg6[%c0_5, %c0_6, %c0_7] : memref<1x32x96xbf16, #tpu.memory_space<vmem>>, vector<1x32x96xbf16>
    %7 = vector.shape_cast %6 : vector<1x32x96xbf16> to vector<32x96xbf16>
    %cst = arith.constant dense<0.000000e+00> : vector<8x96xf32>
    %8 = tpu.matmul %5, %7, %cst {dimension_numbers = #tpu.dot_dimension_numbers<[1], [0], [0], [1], [0, 0, 1, 1], [], []>} : vector<8x32xbf16>, vector<32x96xbf16>, vector<8x96xf32> -> vector<8x96xf32>
    %c0_8 = arith.constant 0 : index
    %c0_9 = arith.constant 0 : index
    %c0_10 = arith.constant 0 : index
    %9 = vector.load %arg7[%c0_8, %c0_9, %c0_10] : memref<1x1x96xf32, #tpu.memory_space<vmem>>, vector<1x1x96xf32>
    %10 = vector.shape_cast %9 : vector<1x1x96xf32> to vector<1x96xf32>
    %11 = vector.broadcast %10 : vector<1x96xf32> to vector<8x96xf32>
    %12 = arith.addf %8, %11 : vector<8x96xf32>
    %c0_11 = arith.constant 0 : index
    %c0_12 = arith.constant 0 : index
    %c0_13 = arith.constant 0 : index
    %13 = vector.load %arg8[%c0_11, %c0_12, %c0_13] : memref<1x32x32xbf16, #tpu.memory_space<vmem>>, vector<1x32x32xbf16>
    %14 = vector.shape_cast %13 : vector<1x32x32xbf16> to vector<32x32xbf16>
    %cst_14 = arith.constant 0.000000e+00 : f32
    %15 = vector.broadcast %cst_14 : f32 to vector<8x32xf32>
    %16 = vector.extract_strided_slice %12 {offsets = [0, 0], sizes = [8, 8], strides = [1, 1]} : vector<8x96xf32> to vector<8x8xf32>
    %17 = arith.truncf %16 : vector<8x8xf32> to vector<8x8xbf16>
    %18 = vector.shape_cast %17 : vector<8x8xbf16> to vector<1x8x8xbf16>
    %19 = vector.extract_strided_slice %12 {offsets = [0, 32], sizes = [8, 8], strides = [1, 1]} : vector<8x96xf32> to vector<8x8xf32>
    %20 = arith.truncf %19 : vector<8x8xf32> to vector<8x8xbf16>
    %21 = vector.shape_cast %20 : vector<8x8xbf16> to vector<1x8x8xbf16>
    %22 = vector.extract_strided_slice %12 {offsets = [0, 64], sizes = [8, 8], strides = [1, 1]} : vector<8x96xf32> to vector<8x8xf32>
    %23 = arith.truncf %22 : vector<8x8xf32> to vector<8x8xbf16>
    %24 = vector.shape_cast %23 : vector<8x8xbf16> to vector<1x8x8xbf16>
    "tpu.trace_start"() <{level = 10 : i32, message = "bqd,bkd->bqk"}> : () -> ()
    %cst_15 = arith.constant dense<0.000000e+00> : vector<1x8x8xf32>
    %25 = tpu.matmul %18, %21, %cst_15 {dimension_numbers = #tpu.dot_dimension_numbers<[2], [2], [1], [1], [0, 0, 0, 1, 1, 1], [0], [0]>} : vector<1x8x8xbf16>, vector<1x8x8xbf16>, vector<1x8x8xf32> -> vector<1x8x8xf32>
    "tpu.trace_stop"() : () -> ()
    %26 = vector.broadcast %4 : vector<1x1x8xf32> to vector<1x8x8xf32>
    %27 = arith.addf %25, %26 : vector<1x8x8xf32>
    %cst_16 = arith.constant dense<0xFF800000> : vector<1x8xf32>
    %28 = vector.multi_reduction <maximumf>, %27, %cst_16 [2] : vector<1x8x8xf32> to vector<1x8xf32>
    %29 = vector.shape_cast %28 : vector<1x8xf32> to vector<1x8x1xf32>
    %30 = vector.broadcast %29 : vector<1x8x1xf32> to vector<1x8x8xf32>
    %31 = arith.subf %27, %30 : vector<1x8x8xf32>
    %32 = math.exp %31 : vector<1x8x8xf32>
    %cst_17 = arith.constant dense<0.000000e+00> : vector<1x8xf32>
    %33 = vector.multi_reduction <add>, %32, %cst_17 [2] : vector<1x8x8xf32> to vector<1x8xf32>
    %34 = vector.shape_cast %33 : vector<1x8xf32> to vector<1x8x1xf32>
    %35 = tpu.reciprocal %34 {approx = true} : vector<1x8x1xf32> -> vector<1x8x1xf32>
    %36 = vector.broadcast %35 : vector<1x8x1xf32> to vector<1x8x8xf32>
    %37 = arith.mulf %32, %36 : vector<1x8x8xf32>
    %38 = arith.truncf %37 : vector<1x8x8xf32> to vector<1x8x8xbf16>
    "tpu.trace_start"() <{level = 10 : i32, message = "bqk,bkd->bqd"}> : () -> ()
    %cst_18 = arith.constant dense<0.000000e+00> : vector<1x8x8xf32>
    %39 = tpu.matmul %38, %24, %cst_18 {dimension_numbers = #tpu.dot_dimension_numbers<[2], [1], [1], [2], [0, 0, 0, 1, 1, 2], [0], [0]>} : vector<1x8x8xbf16>, vector<1x8x8xbf16>, vector<1x8x8xf32> -> vector<1x8x8xf32>
    "tpu.trace_stop"() : () -> ()
    %40 = vector.shape_cast %39 : vector<1x8x8xf32> to vector<8x8xf32>
    %41 = arith.truncf %40 : vector<8x8xf32> to vector<8x8xbf16>
    %42 = vector.extract_strided_slice %14 {offsets = [0, 0], sizes = [8, 32], strides = [1, 1]} : vector<32x32xbf16> to vector<8x32xbf16>
    %cst_19 = arith.constant dense<0.000000e+00> : vector<8x32xf32>
    %43 = tpu.matmul %41, %42, %cst_19 {dimension_numbers = #tpu.dot_dimension_numbers<[1], [0], [0], [1], [0, 0, 1, 1], [], []>} : vector<8x8xbf16>, vector<8x32xbf16>, vector<8x32xf32> -> vector<8x32xf32>
    %44 = arith.addf %15, %43 : vector<8x32xf32>
    %45 = vector.extract_strided_slice %12 {offsets = [0, 8], sizes = [8, 8], strides = [1, 1]} : vector<8x96xf32> to vector<8x8xf32>
    %46 = arith.truncf %45 : vector<8x8xf32> to vector<8x8xbf16>
    %47 = vector.shape_cast %46 : vector<8x8xbf16> to vector<1x8x8xbf16>
    %48 = vector.extract_strided_slice %12 {offsets = [0, 40], sizes = [8, 8], strides = [1, 1]} : vector<8x96xf32> to vector<8x8xf32>
    %49 = arith.truncf %48 : vector<8x8xf32> to vector<8x8xbf16>
    %50 = vector.shape_cast %49 : vector<8x8xbf16> to vector<1x8x8xbf16>
    %51 = vector.extract_strided_slice %12 {offsets = [0, 72], sizes = [8, 8], strides = [1, 1]} : vector<8x96xf32> to vector<8x8xf32>
    %52 = arith.truncf %51 : vector<8x8xf32> to vector<8x8xbf16>
    %53 = vector.shape_cast %52 : vector<8x8xbf16> to vector<1x8x8xbf16>
    "tpu.trace_start"() <{level = 10 : i32, message = "bqd,bkd->bqk"}> : () -> ()
    %cst_20 = arith.constant dense<0.000000e+00> : vector<1x8x8xf32>
    %54 = tpu.matmul %47, %50, %cst_20 {dimension_numbers = #tpu.dot_dimension_numbers<[2], [2], [1], [1], [0, 0, 0, 1, 1, 1], [0], [0]>} : vector<1x8x8xbf16>, vector<1x8x8xbf16>, vector<1x8x8xf32> -> vector<1x8x8xf32>
    "tpu.trace_stop"() : () -> ()
    %55 = vector.broadcast %4 : vector<1x1x8xf32> to vector<1x8x8xf32>
    %56 = arith.addf %54, %55 : vector<1x8x8xf32>
    %cst_21 = arith.constant dense<0xFF800000> : vector<1x8xf32>
    %57 = vector.multi_reduction <maximumf>, %56, %cst_21 [2] : vector<1x8x8xf32> to vector<1x8xf32>
    %58 = vector.shape_cast %57 : vector<1x8xf32> to vector<1x8x1xf32>
    %59 = vector.broadcast %58 : vector<1x8x1xf32> to vector<1x8x8xf32>
    %60 = arith.subf %56, %59 : vector<1x8x8xf32>
    %61 = math.exp %60 : vector<1x8x8xf32>
    %cst_22 = arith.constant dense<0.000000e+00> : vector<1x8xf32>
    %62 = vector.multi_reduction <add>, %61, %cst_22 [2] : vector<1x8x8xf32> to vector<1x8xf32>
    %63 = vector.shape_cast %62 : vector<1x8xf32> to vector<1x8x1xf32>
    %64 = tpu.reciprocal %63 {approx = true} : vector<1x8x1xf32> -> vector<1x8x1xf32>
    %65 = vector.broadcast %64 : vector<1x8x1xf32> to vector<1x8x8xf32>
    %66 = arith.mulf %61, %65 : vector<1x8x8xf32>
    %67 = arith.truncf %66 : vector<1x8x8xf32> to vector<1x8x8xbf16>
    "tpu.trace_start"() <{level = 10 : i32, message = "bqk,bkd->bqd"}> : () -> ()
    %cst_23 = arith.constant dense<0.000000e+00> : vector<1x8x8xf32>
    %68 = tpu.matmul %67, %53, %cst_23 {dimension_numbers = #tpu.dot_dimension_numbers<[2], [1], [1], [2], [0, 0, 0, 1, 1, 2], [0], [0]>} : vector<1x8x8xbf16>, vector<1x8x8xbf16>, vector<1x8x8xf32> -> vector<1x8x8xf32>
    "tpu.trace_stop"() : () -> ()
    %69 = vector.shape_cast %68 : vector<1x8x8xf32> to vector<8x8xf32>
    %70 = arith.truncf %69 : vector<8x8xf32> to vector<8x8xbf16>
    %71 = vector.extract_strided_slice %14 {offsets = [8, 0], sizes = [8, 32], strides = [1, 1]} : vector<32x32xbf16> to vector<8x32xbf16>
    %cst_24 = arith.constant dense<0.000000e+00> : vector<8x32xf32>
    %72 = tpu.matmul %70, %71, %cst_24 {dimension_numbers = #tpu.dot_dimension_numbers<[1], [0], [0], [1], [0, 0, 1, 1], [], []>} : vector<8x8xbf16>, vector<8x32xbf16>, vector<8x32xf32> -> vector<8x32xf32>
    %73 = arith.addf %44, %72 : vector<8x32xf32>
    %74 = vector.extract_strided_slice %12 {offsets = [0, 16], sizes = [8, 8], strides = [1, 1]} : vector<8x96xf32> to vector<8x8xf32>
    %75 = arith.truncf %74 : vector<8x8xf32> to vector<8x8xbf16>
    %76 = vector.shape_cast %75 : vector<8x8xbf16> to vector<1x8x8xbf16>
    %77 = vector.extract_strided_slice %12 {offsets = [0, 48], sizes = [8, 8], strides = [1, 1]} : vector<8x96xf32> to vector<8x8xf32>
    %78 = arith.truncf %77 : vector<8x8xf32> to vector<8x8xbf16>
    %79 = vector.shape_cast %78 : vector<8x8xbf16> to vector<1x8x8xbf16>
    %80 = vector.extract_strided_slice %12 {offsets = [0, 80], sizes = [8, 8], strides = [1, 1]} : vector<8x96xf32> to vector<8x8xf32>
    %81 = arith.truncf %80 : vector<8x8xf32> to vector<8x8xbf16>
    %82 = vector.shape_cast %81 : vector<8x8xbf16> to vector<1x8x8xbf16>
    "tpu.trace_start"() <{level = 10 : i32, message = "bqd,bkd->bqk"}> : () -> ()
    %cst_25 = arith.constant dense<0.000000e+00> : vector<1x8x8xf32>
    %83 = tpu.matmul %76, %79, %cst_25 {dimension_numbers = #tpu.dot_dimension_numbers<[2], [2], [1], [1], [0, 0, 0, 1, 1, 1], [0], [0]>} : vector<1x8x8xbf16>, vector<1x8x8xbf16>, vector<1x8x8xf32> -> vector<1x8x8xf32>
    "tpu.trace_stop"() : () -> ()
    %84 = vector.broadcast %4 : vector<1x1x8xf32> to vector<1x8x8xf32>
    %85 = arith.addf %83, %84 : vector<1x8x8xf32>
    %cst_26 = arith.constant dense<0xFF800000> : vector<1x8xf32>
    %86 = vector.multi_reduction <maximumf>, %85, %cst_26 [2] : vector<1x8x8xf32> to vector<1x8xf32>
    %87 = vector.shape_cast %86 : vector<1x8xf32> to vector<1x8x1xf32>
    %88 = vector.broadcast %87 : vector<1x8x1xf32> to vector<1x8x8xf32>
    %89 = arith.subf %85, %88 : vector<1x8x8xf32>
    %90 = math.exp %89 : vector<1x8x8xf32>
    %cst_27 = arith.constant dense<0.000000e+00> : vector<1x8xf32>
    %91 = vector.multi_reduction <add>, %90, %cst_27 [2] : vector<1x8x8xf32> to vector<1x8xf32>
    %92 = vector.shape_cast %91 : vector<1x8xf32> to vector<1x8x1xf32>
    %93 = tpu.reciprocal %92 {approx = true} : vector<1x8x1xf32> -> vector<1x8x1xf32>
    %94 = vector.broadcast %93 : vector<1x8x1xf32> to vector<1x8x8xf32>
    %95 = arith.mulf %90, %94 : vector<1x8x8xf32>
    %96 = arith.truncf %95 : vector<1x8x8xf32> to vector<1x8x8xbf16>
    "tpu.trace_start"() <{level = 10 : i32, message = "bqk,bkd->bqd"}> : () -> ()
    %cst_28 = arith.constant dense<0.000000e+00> : vector<1x8x8xf32>
    %97 = tpu.matmul %96, %82, %cst_28 {dimension_numbers = #tpu.dot_dimension_numbers<[2], [1], [1], [2], [0, 0, 0, 1, 1, 2], [0], [0]>} : vector<1x8x8xbf16>, vector<1x8x8xbf16>, vector<1x8x8xf32> -> vector<1x8x8xf32>
    "tpu.trace_stop"() : () -> ()
    %98 = vector.shape_cast %97 : vector<1x8x8xf32> to vector<8x8xf32>
    %99 = arith.truncf %98 : vector<8x8xf32> to vector<8x8xbf16>
    %100 = vector.extract_strided_slice %14 {offsets = [16, 0], sizes = [8, 32], strides = [1, 1]} : vector<32x32xbf16> to vector<8x32xbf16>
    %cst_29 = arith.constant dense<0.000000e+00> : vector<8x32xf32>
    %101 = tpu.matmul %99, %100, %cst_29 {dimension_numbers = #tpu.dot_dimension_numbers<[1], [0], [0], [1], [0, 0, 1, 1], [], []>} : vector<8x8xbf16>, vector<8x32xbf16>, vector<8x32xf32> -> vector<8x32xf32>
    %102 = arith.addf %73, %101 : vector<8x32xf32>
    %103 = vector.extract_strided_slice %12 {offsets = [0, 24], sizes = [8, 8], strides = [1, 1]} : vector<8x96xf32> to vector<8x8xf32>
    %104 = arith.truncf %103 : vector<8x8xf32> to vector<8x8xbf16>
    %105 = vector.shape_cast %104 : vector<8x8xbf16> to vector<1x8x8xbf16>
    %106 = vector.extract_strided_slice %12 {offsets = [0, 56], sizes = [8, 8], strides = [1, 1]} : vector<8x96xf32> to vector<8x8xf32>
    %107 = arith.truncf %106 : vector<8x8xf32> to vector<8x8xbf16>
    %108 = vector.shape_cast %107 : vector<8x8xbf16> to vector<1x8x8xbf16>
    %109 = vector.extract_strided_slice %12 {offsets = [0, 88], sizes = [8, 8], strides = [1, 1]} : vector<8x96xf32> to vector<8x8xf32>
    %110 = arith.truncf %109 : vector<8x8xf32> to vector<8x8xbf16>
    %111 = vector.shape_cast %110 : vector<8x8xbf16> to vector<1x8x8xbf16>
    "tpu.trace_start"() <{level = 10 : i32, message = "bqd,bkd->bqk"}> : () -> ()
    %cst_30 = arith.constant dense<0.000000e+00> : vector<1x8x8xf32>
    %112 = tpu.matmul %105, %108, %cst_30 {dimension_numbers = #tpu.dot_dimension_numbers<[2], [2], [1], [1], [0, 0, 0, 1, 1, 1], [0], [0]>} : vector<1x8x8xbf16>, vector<1x8x8xbf16>, vector<1x8x8xf32> -> vector<1x8x8xf32>
    "tpu.trace_stop"() : () -> ()
    %113 = vector.broadcast %4 : vector<1x1x8xf32> to vector<1x8x8xf32>
    %114 = arith.addf %112, %113 : vector<1x8x8xf32>
    %cst_31 = arith.constant dense<0xFF800000> : vector<1x8xf32>
    %115 = vector.multi_reduction <maximumf>, %114, %cst_31 [2] : vector<1x8x8xf32> to vector<1x8xf32>
    %116 = vector.shape_cast %115 : vector<1x8xf32> to vector<1x8x1xf32>
    %117 = vector.broadcast %116 : vector<1x8x1xf32> to vector<1x8x8xf32>
    %118 = arith.subf %114, %117 : vector<1x8x8xf32>
    %119 = math.exp %118 : vector<1x8x8xf32>
    %cst_32 = arith.constant dense<0.000000e+00> : vector<1x8xf32>
    %120 = vector.multi_reduction <add>, %119, %cst_32 [2] : vector<1x8x8xf32> to vector<1x8xf32>
    %121 = vector.shape_cast %120 : vector<1x8xf32> to vector<1x8x1xf32>
    %122 = tpu.reciprocal %121 {approx = true} : vector<1x8x1xf32> -> vector<1x8x1xf32>
    %123 = vector.broadcast %122 : vector<1x8x1xf32> to vector<1x8x8xf32>
    %124 = arith.mulf %119, %123 : vector<1x8x8xf32>
    %125 = arith.truncf %124 : vector<1x8x8xf32> to vector<1x8x8xbf16>
    "tpu.trace_start"() <{level = 10 : i32, message = "bqk,bkd->bqd"}> : () -> ()
    %cst_33 = arith.constant dense<0.000000e+00> : vector<1x8x8xf32>
    %126 = tpu.matmul %125, %111, %cst_33 {dimension_numbers = #tpu.dot_dimension_numbers<[2], [1], [1], [2], [0, 0, 0, 1, 1, 2], [0], [0]>} : vector<1x8x8xbf16>, vector<1x8x8xbf16>, vector<1x8x8xf32> -> vector<1x8x8xf32>
    "tpu.trace_stop"() : () -> ()
    %127 = vector.shape_cast %126 : vector<1x8x8xf32> to vector<8x8xf32>
    %128 = arith.truncf %127 : vector<8x8xf32> to vector<8x8xbf16>
    %129 = vector.extract_strided_slice %14 {offsets = [24, 0], sizes = [8, 32], strides = [1, 1]} : vector<32x32xbf16> to vector<8x32xbf16>
    %cst_34 = arith.constant dense<0.000000e+00> : vector<8x32xf32>
    %130 = tpu.matmul %128, %129, %cst_34 {dimension_numbers = #tpu.dot_dimension_numbers<[1], [0], [0], [1], [0, 0, 1, 1], [], []>} : vector<8x8xbf16>, vector<8x32xbf16>, vector<8x32xf32> -> vector<8x32xf32>
    %131 = arith.addf %102, %130 : vector<8x32xf32>
    %132 = arith.addf %3, %131 : vector<8x32xf32>
    %c0_35 = arith.constant 0 : index
    %c0_36 = arith.constant 0 : index
    %c0_37 = arith.constant 0 : index
    %133 = vector.load %arg9[%c0_35, %c0_36, %c0_37] : memref<1x1x32xf32, #tpu.memory_space<vmem>>, vector<1x1x32xf32>
    %134 = vector.shape_cast %133 : vector<1x1x32xf32> to vector<1x32xf32>
    %135 = vector.broadcast %134 : vector<1x32xf32> to vector<8x32xf32>
    %136 = arith.addf %132, %135 : vector<8x32xf32>
    %c0_38 = arith.constant 0 : index
    %c0_39 = arith.constant 0 : index
    %c0_40 = arith.constant 0 : index
    %137 = vector.load %arg10[%c0_38, %c0_39, %c0_40] : memref<1x1x32xf32, #tpu.memory_space<vmem>>, vector<1x1x32xf32>
    %138 = vector.shape_cast %137 : vector<1x1x32xf32> to vector<1x32xf32>
    %c0_41 = arith.constant 0 : index
    %c0_42 = arith.constant 0 : index
    %c0_43 = arith.constant 0 : index
    %139 = vector.load %arg11[%c0_41, %c0_42, %c0_43] : memref<1x1x32xf32, #tpu.memory_space<vmem>>, vector<1x1x32xf32>
    %140 = vector.shape_cast %139 : vector<1x1x32xf32> to vector<1x32xf32>
    %cst_44 = arith.constant dense<0.000000e+00> : vector<8xf32>
    %141 = vector.multi_reduction <add>, %136, %cst_44 [1] : vector<8x32xf32> to vector<8xf32>
    %142 = vector.shape_cast %141 : vector<8xf32> to vector<8x1xf32>
    %cst_45 = arith.constant 3.200000e+01 : f32
    %143 = vector.broadcast %cst_45 : f32 to vector<8x1xf32>
    %144 = arith.divf %142, %143 : vector<8x1xf32>
    %145 = vector.broadcast %144 : vector<8x1xf32> to vector<8x32xf32>
    %146 = arith.subf %136, %145 : vector<8x32xf32>
    %147 = arith.mulf %146, %146 : vector<8x32xf32>
    %cst_46 = arith.constant dense<0.000000e+00> : vector<8xf32>
    %148 = vector.multi_reduction <add>, %147, %cst_46 [1] : vector<8x32xf32> to vector<8xf32>
    %149 = vector.shape_cast %148 : vector<8xf32> to vector<8x1xf32>
    %cst_47 = arith.constant 3.200000e+01 : f32
    %150 = vector.broadcast %cst_47 : f32 to vector<8x1xf32>
    %151 = arith.divf %149, %150 : vector<8x1xf32>
    %152 = vector.broadcast %144 : vector<8x1xf32> to vector<8x32xf32>
    %153 = arith.subf %136, %152 : vector<8x32xf32>
    %cst_48 = arith.constant 9.99999996E-13 : f32
    %154 = vector.broadcast %cst_48 : f32 to vector<8x1xf32>
    %155 = arith.addf %151, %154 : vector<8x1xf32>
    %156 = math.rsqrt %155 : vector<8x1xf32>
    %157 = vector.broadcast %156 : vector<8x1xf32> to vector<8x32xf32>
    %158 = arith.mulf %153, %157 : vector<8x32xf32>
    %159 = vector.broadcast %138 : vector<1x32xf32> to vector<8x32xf32>
    %160 = arith.mulf %158, %159 : vector<8x32xf32>
    %161 = vector.broadcast %140 : vector<1x32xf32> to vector<8x32xf32>
    %162 = arith.addf %160, %161 : vector<8x32xf32>
    %163 = arith.truncf %162 : vector<8x32xf32> to vector<8x32xbf16>
    %c0_49 = arith.constant 0 : index
    %c0_50 = arith.constant 0 : index
    %c0_51 = arith.constant 0 : index
    %164 = vector.load %arg12[%c0_49, %c0_50, %c0_51] : memref<1x32x64xbf16, #tpu.memory_space<vmem>>, vector<1x32x64xbf16>
    %165 = vector.shape_cast %164 : vector<1x32x64xbf16> to vector<32x64xbf16>
    %cst_52 = arith.constant dense<0.000000e+00> : vector<8x64xf32>
    %166 = tpu.matmul %163, %165, %cst_52 {dimension_numbers = #tpu.dot_dimension_numbers<[1], [0], [0], [1], [0, 0, 1, 1], [], []>} : vector<8x32xbf16>, vector<32x64xbf16>, vector<8x64xf32> -> vector<8x64xf32>
    %c0_53 = arith.constant 0 : index
    %c0_54 = arith.constant 0 : index
    %c0_55 = arith.constant 0 : index
    %167 = vector.load %arg13[%c0_53, %c0_54, %c0_55] : memref<1x1x64xf32, #tpu.memory_space<vmem>>, vector<1x1x64xf32>
    %168 = vector.shape_cast %167 : vector<1x1x64xf32> to vector<1x64xf32>
    %169 = vector.broadcast %168 : vector<1x64xf32> to vector<8x64xf32>
    %170 = arith.addf %166, %169 : vector<8x64xf32>
    %171 = arith.mulf %170, %170 : vector<8x64xf32>
    %172 = arith.mulf %170, %171 : vector<8x64xf32>
    %cst_56 = arith.constant 4.471500e-02 : f32
    %173 = vector.broadcast %cst_56 : f32 to vector<8x64xf32>
    %174 = arith.mulf %173, %172 : vector<8x64xf32>
    %175 = arith.addf %170, %174 : vector<8x64xf32>
    %cst_57 = arith.constant 0.797884583 : f32
    %176 = vector.broadcast %cst_57 : f32 to vector<8x64xf32>
    %177 = arith.mulf %176, %175 : vector<8x64xf32>
    %178 = math.tanh %177 : vector<8x64xf32>
    %cst_58 = arith.constant 1.000000e+00 : f32
    %179 = vector.broadcast %cst_58 : f32 to vector<8x64xf32>
    %180 = arith.addf %179, %178 : vector<8x64xf32>
    %cst_59 = arith.constant 5.000000e-01 : f32
    %181 = vector.broadcast %cst_59 : f32 to vector<8x64xf32>
    %182 = arith.mulf %181, %180 : vector<8x64xf32>
    %183 = arith.mulf %170, %182 : vector<8x64xf32>
    %184 = arith.truncf %183 : vector<8x64xf32> to vector<8x64xbf16>
    %c0_60 = arith.constant 0 : index
    %c0_61 = arith.constant 0 : index
    %c0_62 = arith.constant 0 : index
    %185 = vector.load %arg14[%c0_60, %c0_61, %c0_62] : memref<1x64x32xbf16, #tpu.memory_space<vmem>>, vector<1x64x32xbf16>
    %186 = vector.shape_cast %185 : vector<1x64x32xbf16> to vector<64x32xbf16>
    %cst_63 = arith.constant dense<0.000000e+00> : vector<8x32xf32>
    %187 = tpu.matmul %184, %186, %cst_63 {dimension_numbers = #tpu.dot_dimension_numbers<[1], [0], [0], [1], [0, 0, 1, 1], [], []>} : vector<8x64xbf16>, vector<64x32xbf16>, vector<8x32xf32> -> vector<8x32xf32>
    %c0_64 = arith.constant 0 : index
    %c0_65 = arith.constant 0 : index
    %c0_66 = arith.constant 0 : index
    %188 = vector.load %arg15[%c0_64, %c0_65, %c0_66] : memref<1x1x32xf32, #tpu.memory_space<vmem>>, vector<1x1x32xf32>
    %189 = vector.shape_cast %188 : vector<1x1x32xf32> to vector<1x32xf32>
    %190 = vector.broadcast %189 : vector<1x32xf32> to vector<8x32xf32>
    %191 = arith.addf %187, %190 : vector<8x32xf32>
    %192 = arith.addf %162, %191 : vector<8x32xf32>
    %c0_67 = arith.constant 0 : index
    %c0_68 = arith.constant 0 : index
    %c0_69 = arith.constant 0 : index
    %193 = vector.load %arg16[%c0_67, %c0_68, %c0_69] : memref<1x1x32xf32, #tpu.memory_space<vmem>>, vector<1x1x32xf32>
    %194 = vector.shape_cast %193 : vector<1x1x32xf32> to vector<1x32xf32>
    %c0_70 = arith.constant 0 : index
    %c0_71 = arith.constant 0 : index
    %c0_72 = arith.constant 0 : index
    %195 = vector.load %arg17[%c0_70, %c0_71, %c0_72] : memref<1x1x32xf32, #tpu.memory_space<vmem>>, vector<1x1x32xf32>
    %196 = vector.shape_cast %195 : vector<1x1x32xf32> to vector<1x32xf32>
    %cst_73 = arith.constant dense<0.000000e+00> : vector<8xf32>
    %197 = vector.multi_reduction <add>, %192, %cst_73 [1] : vector<8x32xf32> to vector<8xf32>
    %198 = vector.shape_cast %197 : vector<8xf32> to vector<8x1xf32>
    %cst_74 = arith.constant 3.200000e+01 : f32
    %199 = vector.broadcast %cst_74 : f32 to vector<8x1xf32>
    %200 = arith.divf %198, %199 : vector<8x1xf32>
    %201 = vector.broadcast %200 : vector<8x1xf32> to vector<8x32xf32>
    %202 = arith.subf %192, %201 : vector<8x32xf32>
    %203 = arith.mulf %202, %202 : vector<8x32xf32>
    %cst_75 = arith.constant dense<0.000000e+00> : vector<8xf32>
    %204 = vector.multi_reduction <add>, %203, %cst_75 [1] : vector<8x32xf32> to vector<8xf32>
    %205 = vector.shape_cast %204 : vector<8xf32> to vector<8x1xf32>
    %cst_76 = arith.constant 3.200000e+01 : f32
    %206 = vector.broadcast %cst_76 : f32 to vector<8x1xf32>
    %207 = arith.divf %205, %206 : vector<8x1xf32>
    %208 = vector.broadcast %200 : vector<8x1xf32> to vector<8x32xf32>
    %209 = arith.subf %192, %208 : vector<8x32xf32>
    %cst_77 = arith.constant 9.99999996E-13 : f32
    %210 = vector.broadcast %cst_77 : f32 to vector<8x1xf32>
    %211 = arith.addf %207, %210 : vector<8x1xf32>
    %212 = math.rsqrt %211 : vector<8x1xf32>
    %213 = vector.broadcast %212 : vector<8x1xf32> to vector<8x32xf32>
    %214 = arith.mulf %209, %213 : vector<8x32xf32>
    %215 = vector.broadcast %194 : vector<1x32xf32> to vector<8x32xf32>
    %216 = arith.mulf %214, %215 : vector<8x32xf32>
    %217 = vector.broadcast %196 : vector<1x32xf32> to vector<8x32xf32>
    %218 = arith.addf %216, %217 : vector<8x32xf32>
    %c0_78 = arith.constant 0 : index
    %c0_79 = arith.constant 0 : index
    %219 = vector.load %arg21[%c0_78, %c0_79] : memref<8x32xf32, #tpu.memory_space<vmem>>, vector<8x32xf32>
    tpu.vector_store %arg21[%c0_78, %c0_79], %218 {strides = array<i32>} : memref<8x32xf32, #tpu.memory_space<vmem>>, vector<8x32xf32>,
    %c1_i32 = arith.constant 1 : i32
    %220 = arith.cmpi eq, %arg1, %c1_i32 : i32
    %221 = arith.extui %220 : i1 to i32
    %c0_i32_80 = arith.constant 0 : i32
    %222 = arith.cmpi ne, %221, %c0_i32_80 : i32
    scf.if %222 {
      %223 = arith.truncf %218 : vector<8x32xf32> to vector<8x32xbf16>
      %c0_81 = arith.constant 0 : index
      %c0_82 = arith.constant 0 : index
      %224 = vector.load %arg18[%c0_81, %c0_82] : memref<32x128xbf16, #tpu.memory_space<vmem>>, vector<32x128xbf16>
      %cst_83 = arith.constant dense<0.000000e+00> : vector<8x128xf32>
      %225 = tpu.matmul %223, %224, %cst_83 {dimension_numbers = #tpu.dot_dimension_numbers<[1], [0], [0], [1], [0, 0, 1, 1], [], []>} : vector<8x32xbf16>, vector<32x128xbf16>, vector<8x128xf32> -> vector<8x128xf32>
      %c0_84 = arith.constant 0 : index
      %c0_85 = arith.constant 0 : index
      %226 = vector.load %arg19[%c0_84, %c0_85] : memref<1x128xf32, #tpu.memory_space<vmem>>, vector<1x128xf32>
      %227 = vector.broadcast %226 : vector<1x128xf32> to vector<8x128xf32>
      %228 = arith.addf %225, %227 : vector<8x128xf32>
      %c0_86 = arith.constant 0 : index
      %c0_87 = arith.constant 0 : index
      %229 = vector.load %arg20[%c0_86, %c0_87] : memref<8x128xf32, #tpu.memory_space<vmem>>, vector<8x128xf32>
      tpu.vector_store %arg20[%c0_86, %c0_87], %228 {strides = array<i32>} : memref<8x128xf32, #tpu.memory_space<vmem>>, vector<8x128xf32>,
    } else {
    }
    return
  }
  func.func @transform_0(%arg0: i32, %arg1: i32) -> (i32, i32) {
    %c0_i32 = arith.constant 0 : i32
    %c0_i32_0 = arith.constant 0 : i32
    return %arg0, %c0_i32 : i32, i32
  }
  func.func @transform_1(%arg0: i32, %arg1: i32) -> (i32, i32, i32) {
    %c0_i32 = arith.constant 0 : i32
    %c0_i32_0 = arith.constant 0 : i32
    %c0_i32_1 = arith.constant 0 : i32
    return %arg0, %c0_i32, %c0_i32_0 : i32, i32, i32
  }
  func.func @transform_2(%arg0: i32, %arg1: i32) -> (i32, i32) {
    %c0_i32 = arith.constant 0 : i32
    %c0_i32_0 = arith.constant 0 : i32
    %c0_i32_1 = arith.constant 0 : i32
    return %c0_i32, %c0_i32_0 : i32, i32
  }
  func.func @transform_3(%arg0: i32, %arg1: i32) -> (i32, i32) {
    %c0_i32 = arith.constant 0 : i32
    %c0_i32_0 = arith.constant 0 : i32
    %c0_i32_1 = arith.constant 0 : i32
    return %c0_i32, %c0_i32_0 : i32, i32
  }
  func.func @transform_4(%arg0: i32, %arg1: i32) -> (i32, i32, i32) {
    %c0_i32 = arith.constant 0 : i32
    %c0_i32_0 = arith.constant 0 : i32
    %c0_i32_1 = arith.constant 0 : i32
    return %arg1, %c0_i32, %c0_i32_0 : i32, i32, i32
  }
  func.func @transform_5(%arg0: i32, %arg1: i32) -> (i32, i32, i32) {
    %c0_i32 = arith.constant 0 : i32
    %c0_i32_0 = arith.constant 0 : i32
    %c0_i32_1 = arith.constant 0 : i32
    return %arg1, %c0_i32, %c0_i32_0 : i32, i32, i32
  }
  func.func @transform_6(%arg0: i32, %arg1: i32) -> (i32, i32, i32) {
    %c0_i32 = arith.constant 0 : i32
    %c0_i32_0 = arith.constant 0 : i32
    %c0_i32_1 = arith.constant 0 : i32
    return %arg1, %c0_i32, %c0_i32_0 : i32, i32, i32
  }
  func.func @transform_7(%arg0: i32, %arg1: i32) -> (i32, i32, i32) {
    %c0_i32 = arith.constant 0 : i32
    %c0_i32_0 = arith.constant 0 : i32
    %c0_i32_1 = arith.constant 0 : i32
    return %arg1, %c0_i32, %c0_i32_0 : i32, i32, i32
  }
  func.func @transform_8(%arg0: i32, %arg1: i32) -> (i32, i32, i32) {
    %c0_i32 = arith.constant 0 : i32
    %c0_i32_0 = arith.constant 0 : i32
    %c0_i32_1 = arith.constant 0 : i32
    return %arg1, %c0_i32, %c0_i32_0 : i32, i32, i32
  }
  func.func @transform_9(%arg0: i32, %arg1: i32) -> (i32, i32, i32) {
    %c0_i32 = arith.constant 0 : i32
    %c0_i32_0 = arith.constant 0 : i32
    %c0_i32_1 = arith.constant 0 : i32
    return %arg1, %c0_i32, %c0_i32_0 : i32, i32, i32
  }
  func.func @transform_10(%arg0: i32, %arg1: i32) -> (i32, i32, i32) {
    %c0_i32 = arith.constant 0 : i32
    %c0_i32_0 = arith.constant 0 : i32
    %c0_i32_1 = arith.constant 0 : i32
    return %arg1, %c0_i32, %c0_i32_0 : i32, i32, i32
  }
  func.func @transform_11(%arg0: i32, %arg1: i32) -> (i32, i32, i32) {
    %c0_i32 = arith.constant 0 : i32
    %c0_i32_0 = arith.constant 0 : i32
    %c0_i32_1 = arith.constant 0 : i32
    return %arg1, %c0_i32, %c0_i32_0 : i32, i32, i32
  }
  func.func @transform_12(%arg0: i32, %arg1: i32) -> (i32, i32, i32) {
    %c0_i32 = arith.constant 0 : i32
    %c0_i32_0 = arith.constant 0 : i32
    %c0_i32_1 = arith.constant 0 : i32
    return %arg1, %c0_i32, %c0_i32_0 : i32, i32, i32
  }
  func.func @transform_13(%arg0: i32, %arg1: i32) -> (i32, i32, i32) {
    %c0_i32 = arith.constant 0 : i32
    %c0_i32_0 = arith.constant 0 : i32
    %c0_i32_1 = arith.constant 0 : i32
    return %arg1, %c0_i32, %c0_i32_0 : i32, i32, i32
  }
  func.func @transform_14(%arg0: i32, %arg1: i32) -> (i32, i32, i32) {
    %c0_i32 = arith.constant 0 : i32
    %c0_i32_0 = arith.constant 0 : i32
    %c0_i32_1 = arith.constant 0 : i32
    return %arg1, %c0_i32, %c0_i32_0 : i32, i32, i32
  }
  func.func @transform_15(%arg0: i32, %arg1: i32) -> (i32, i32, i32) {
    %c0_i32 = arith.constant 0 : i32
    %c0_i32_0 = arith.constant 0 : i32
    %c0_i32_1 = arith.constant 0 : i32
    return %arg1, %c0_i32, %c0_i32_0 : i32, i32, i32
  }
  func.func @transform_16(%arg0: i32, %arg1: i32) -> (i32, i32) {
    %c0_i32 = arith.constant 0 : i32
    %c0_i32_0 = arith.constant 0 : i32
    %c0_i32_1 = arith.constant 0 : i32
    return %c0_i32, %c0_i32_0 : i32, i32
  }
  func.func @transform_17(%arg0: i32, %arg1: i32) -> (i32, i32) {
    %c0_i32 = arith.constant 0 : i32
    %c0_i32_0 = arith.constant 0 : i32
    %c0_i32_1 = arith.constant 0 : i32
    return %c0_i32, %c0_i32_0 : i32, i32
  }
  func.func @transform_18(%arg0: i32, %arg1: i32) -> (i32, i32) {
    %c0_i32 = arith.constant 0 : i32
    %c0_i32_0 = arith.constant 0 : i32
    return %arg0, %c0_i32 : i32, i32
  }
}

</mosaic_0001>

<bundles_post_ra>
// kernel: custom_bert_forward.1
= control target key start
LH: loop header
LB: loop body
LE: loop exit
PB: predicated region body
PF: predicated region fallthrough
CT: control target
= control target key end

     0   :  { %s2480_s27 = smov 0   ;;  %s2482_s28 = smov 0   ;;  %s2796_s0 = inlined_call_operand.vmem [shape: f32[16,32], index: 0, kind: input, shape index: {}]   ;;  %s2797_s1 = inlined_call_operand.vmem [shape: f32[2,1,8], index: 1, kind: input, shape index: {}]   ;;  %s2798_s2 = inlined_call_operand.vmem [shape: f32[1,32], index: 2, kind: input, shape index: {}]   ;;  %s2799_s3 = inlined_call_operand.vmem [shape: f32[1,32], index: 3, kind: input, shape index: {}]   ;;  %s2800_s4 = inlined_call_operand.vmem [shape: bf16[2,32,96], index: 4, kind: input, shape index: {}]   ;;  %s2801_s5 = inlined_call_operand.vmem [shape: f32[2,1,96], index: 5, kind: input, shape index: {}]   ;;  %s2802_s6 = inlined_call_operand.vmem [shape: bf16[2,32,32], index: 6, kind: input, shape index: {}]   ;;  %s2803_s7 = inlined_call_operand.vmem [shape: f32[2,1,32], index: 7, kind: input, shape index: {}]   ;;  %s2804_s8 = inlined_call_operand.vmem [shape: f32[2,1,32], index: 8, kind: input, shape index: {}]   ;;  %s2805_s9 = inlined_call_operand.vmem [shape: f32[2,1,32], index: 9, kind: input, shape index: {}]   ;;  %s2806_s10 = inlined_call_operand.vmem [shape: bf16[2,32,64], index: 10, kind: input, shape index: {}]   ;;  %s2807_s11 = inlined_call_operand.vmem [shape: f32[2,1,64], index: 11, kind: input, shape index: {}]   ;;  %s2808_s12 = inlined_call_operand.vmem [shape: bf16[2,64,32], index: 12, kind: input, shape index: {}]   ;;  %s2809_s13 = inlined_call_operand.vmem [shape: f32[2,1,32], index: 13, kind: input, shape index: {}]   ;;  %s2810_s14 = inlined_call_operand.vmem [shape: f32[2,1,32], index: 14, kind: input, shape index: {}]   ;;  %s2811_s15 = inlined_call_operand.vmem [shape: f32[2,1,32], index: 15, kind: input, shape index: {}]   ;;  %s2812_s16 = inlined_call_operand.vmem [shape: bf16[32,128], index: 16, kind: input, shape index: {}]   ;;  %s2813_s17 = inlined_call_operand.vmem [shape: f32[1,128], index: 17, kind: input, shape index: {}]   ;;  %s2814_s18 = inlined_call_operand.vmem [shape: f32[16,128], index: 18, kind: output, shape index: {}]  }
   0x1   :  { %2821 = sst [smem:[#allocation10_spill]] %s2796_s0  ;;  %s2484_s29 = smov 0  }
   0x2   :  { %2822 = sst [smem:[#allocation11_spill]] %s2797_s1  ;;  %s2486_s30 = smov 0  }
   0x3   :  { %2823 = sst [smem:[#allocation12_spill]] %s2798_s2  ;;  %s2488_s0 = smov 0  }
   0x4   :  { %2824 = sst [smem:[#allocation13_spill]] %s2799_s3 }
   0x5   :  { %2825 = sst [smem:[#allocation14_spill]] %s2800_s4 }
   0x6   :  { %2826 = sst [smem:[#allocation15_spill]] %s2802_s6 }
   0x7   :  { %2827 = sst [smem:[#allocation16_spill]] %s2806_s10 }
   0x8   :  { %2828 = sst [smem:[#allocation17_spill]] %s2807_s11 }
   0x9   :  { %2829 = sst [smem:[#allocation18_spill]] %s2811_s15 }
   0xa   :  { %2830 = sst [smem:[#allocation19_spill]] %s2812_s16 }
   0xb   :  { %2831 = sst [smem:[#allocation20_spill]] %s2813_s17 }
   0xc   :  { %2832 = sst [smem:[#allocation21_spill]] %s2814_s18 }
   0xd LB: > { %2833 = sst [smem:[#allocation3_spill]] %s2352_s27  ;;  %s37_s19 = sadd.s32 1, %s2360_s29  ;;  %s2368_s0 = sphi %s2488_s0, %s28_s0   ;;  %s2364_s30 = sphi %s2486_s30, %s2869_s30   ;;  %s2360_s29 = sphi %s2484_s29, %s2868_s29   ;;  %s2356_s28 = sphi %s2482_s28, %s2867_s28   ;;  %s2352_s27 = sphi %s2480_s27, %s2866_s27  }
   0xe   : > { %2834 = sst [smem:[#allocation4_spill]] %s2360_s29  ;;  %s40_s1 = sadd.s32 1, %s2364_s30 }
   0xf   : > { %2835 = sst [smem:[#allocation5_spill]] %s2364_s30  ;;  %p38_p0 = scmp.ge.s32.totalorder %s37_s19, 2 }
  0x10   : > { %2836 = sst [smem:[#allocation6_spill]] %s2368_s0  ;;  %p2038_p1 = scmp.ge.s32.totalorder %s2368_s0, 1 }
  0x11   : > { %p635_p2 = scmp.lt.s32.totalorder %s2368_s0, 5  ;;  %s2871_s19 = smov (%p38_p0, %s37_s19), 0 }
  0x12   : > { %2837 = sst [smem:[#allocation7_spill]] %s2871_s19  ;;  %s2873_s1 = smov (!%p38_p0, %s40_s1), %s2364_s30 }
  0x13   : > { %p636_p3 = pnand %p2038_p1, %p635_p2  ;;  %p42_p4 = scmp.ge.s32.totalorder %s2873_s1, 2 }
  0x15   : > { %s2875_s1 = smov (%p42_p4, %s2873_s1), 0  ;;  %639 = sbr.rel (%p636_p3) target bundleno = 4272 (0x10b0), region = 92 }
  0x16   : > { %2838 = sst [smem:[#allocation8_spill]] %s2875_s1 }
  0x1c   : > { %p734_p5 = scmp.lt.s32.totalorder %s2356_s28, 1  ;;  %p741_p6 = scmp.lt.s32.totalorder %s2352_s27, 1 }
  0x1d   : > { %s2841_s1 = sld [smem:[#allocation10_spill]]  ;;  %s2842_s4 = sld [smem:[#allocation14_spill]] }
  0x1e   : > { %s2877_s28 = smov (!%p734_p5, %s2356_s28), 1  ;;  %s2843_s6 = sld [smem:[#allocation15_spill]] }
  0x1f   : > { %2839 = sst [smem:[#allocation9_spill]] %s2877_s28  ;;  %s2039_s21 = sshll.u32 %s2877_s28, 3 }
  0x20   : > { %s2516_s20 = scalar_select %p741_p6, %s2352_s27, 1 }
  0x21   : > { %s2844_s10 = sld [smem:[#allocation16_spill]]  ;;  %s2847_s27 = sld [smem:[#allocation21_spill]] }
  0x22   : > { %s2091_s30 = sshll.u32 %s2516_s20, 4  ;;  %s778_s25 = scalar_lea.vmem %s2809_s13, %s2516_s20 }
  0x23   : > { %s737_s19 = scalar_lea.vmem %s2841_s1, %s2039_s21  ;;  %s2530_s17 = scalar_lea.vmem %s2842_s4, %s2091_s30 }
  0x24   : > { %s2539_s22 = scalar_lea.vmem %s2843_s6, %s2091_s30  ;;  %s2094_s6 = sshll.u32 %s2516_s20, 5 }
  0x25   : > { %s2570_s24 = scalar_lea.vmem %s2808_s12, %s2094_s6  ;;  %s781_s28 = scalar_lea.vmem %s2810_s14, %s2516_s20 }
  0x26   : > { %s2846_s4 = sld [smem:[#allocation18_spill]]  ;;  %s2848_s2 = sld [smem:[#allocation3_spill]] }
  0x27   : > { %s2556_s16 = scalar_lea.vmem %s2844_s10, %s2091_s30  ;;  %s2583_s11 = scalar_lea.vmem %s2847_s27, %s2039_s21 }
  0x2c   : > { %s784_s10 = scalar_lea.vmem %s2846_s4, %s2516_s20  ;;  %p2049_p7 = scmp.ne.s32.totalorder %s2848_s2, 0 }
  0x2d   : > { %v794_v0 = vld [vmem:[%s737_s19] sm:$0xff] (!%p2049_p7)  ;;  %vm797_vm0 = vcmask (!%p2049_p7), 261120   ;;  %s2849_s27 = sld [smem:[#allocation12_spill]] (!%p2049_p7)  ;;  %s2850_s23 = sld [smem:[#allocation13_spill]] (!%p2049_p7) }
  0x2e   : > { %793 = sbr.rel (%p2049_p7) target bundleno = 360 (0x168), region = 96  ;;  %v798_v1 = vsel (!%p2049_p7), %vm797_vm0, %v794_v0, 0.0 }
  0x2f   : > { %799 = vadd.xlane.f32.xlu0 (!%p2049_p7), %v798_v1 }
  0x33   : > { %v2050_v11 = vld [vmem:[%s2849_s27] ss:$0 sm:$0xff] (!%p2049_p7) }
  0x34   : > { %v2051_v13 = vld [vmem:[%s2850_s23] ss:$0 sm:$0xff] (!%p2049_p7) }
  0xbc   : > { %v800_v2 = vpop.xlane.xlu0 %799 }
  0xbd   : > { %v802_v3 = vmul.f32 0.03125, %v800_v2 }
  0xbf   : > { %v803_v4 = vsub.f32 %v794_v0, %v802_v3 }
  0xc1   : > { %v804_v5 = vmul.f32 %v803_v4, %v803_v4 }
  0xc3   : > { %v805_v6 = vsel %vm797_vm0, %v804_v5, 0.0 }
  0xc4   : > { %806 = vadd.xlane.f32.xlu0 %v805_v6 }
 0x151   : > { %v807_v7 = vpop.xlane.xlu0 %806 }
 0x152   : > { %v808_v8 = vmul.f32 0.03125, %v807_v7 }
 0x154   : > { %v809_v9 = vadd.f32 1e-12, %v808_v8 }
 0x156   : > { %2296 = vrsqrt.f32 %v809_v9 }
 0x160   : > { %v2297_v10 = vpop.eup %2296 }
 0x161   : > { %v811_v12 = vmul.f32 %v2297_v10, %v803_v4 }
 0x163   : > { %v818_v14 = vmul.f32 %v2050_v11, %v811_v12 }
 0x165   : > { %v825_v15 = vadd.f32 %v2051_v13, %v818_v14 }
 0x167   : > { %826 = vst.msk [vmem:[#allocation2] sm:$0xff] %vm797_vm0, %v825_v15 }
 0x168 PF: > { %v2298_v16 = vld [vmem:[%s2530_s17] sm:$0xff]   ;;  %v2370_v17 = vmov 0.0   ;;  %v2299_v18 = vld [vmem:[%s2530_s17 + $0x8] sm:$0xff]   ;;  %vm2371_vm1 = vmmov 0   ;;  %vm853_vm2 = vcmask 261120   ;;  %s2851_s26 = scalar_lea.vmem %s2801_s5, %s2516_s20  ;;  %s2372_s29 = smov 120  }
 0x169   : > { %2133 = vmatprep.subr.bf16.mxu1 %v2370_v17  ;;  %2147 = vmatprep.subr.bf16.mxu0 %v2370_v17  ;;  %v2052_v21 = vld [vmem:[%s2851_s26] ss:$0 sm:$0xff]  ;;  %s2373_s0 = smov 96   ;;  %s2374_s30 = smov 88   ;;  %vm911_vm3 = vcmask 64512   ;;  %vm975_vm4 = vcmask 1043456  }
 0x16a   : > { %2134 = vmatpush3.bf16.msra.mxu1 %v2298_v16  ;;  %2137 = vmatprep.mubr.msk.bf16.mxu1 %vm2371_vm1, %v2370_v17  ;;  %s2852_s3 = sld [smem:[#allocation9_spill]]  ;;  %s2853_s2 = sld [smem:[#allocation11_spill]]  ;;  %v897_v4 = vld [vmem:[%s2539_s22] sm:$0xf]  ;;  %v898_v6 = vld [vmem:[%s2539_s22 + $0x4] sm:$0xf] }
 0x16b   : > { %2135 = vmatprep.subr.bf16.mxu1 %v2370_v17  ;;  %2149 = vmatprep.mubr.msk.bf16.mxu0 %vm2371_vm1, %v2370_v17  ;;  %s2375_s6 = smov 64   ;;  %s2376_s27 = smov 56   ;;  %v1181_v5 = vsel %vm975_vm4, %v897_v4, 0  ;;  %v1135_v7 = vsel %vm975_vm4, %v898_v6, 0  ;;  %vm1694_vm5 = vcmask 523264  }
 0x16c   : > { %s2377_s19 = smov 112   ;;  %s2378_s21 = smov 80  }
 0x16d   : > { %s2379_s23 = smov 72   ;;  %s2380_s17 = smov 104  }
 0x16e   : > { %v2601_v19 = vld [vmem:[#allocation2] sm:$0xff]  ;;  %2136 = vmatpush3.bf16.msra.mxu1 %v2299_v18  ;;  %s2381_s1 = smov 48   ;;  %s2382_s26 = smov 40  }
 0x16f   : > { %v829_v20 = vpack.c.bf16 %v2601_v19, %v2601_v19  ;;  %2141 = vmatprep.subr.bf16.mxu1 %v2370_v17  ;;  %s2856_s15 = scalar_lea.vmem %s2804_s8, %s2516_s20 }
 0x170   : > { %s2854_s4 = scalar_lea.vmem %s2853_s2, %s2852_s3 }
 0x171   : > { %2138 = vmatmul.mubr.msk.bf16.vlgmr.msra.gmra.mrb[0].mxu1 %vm853_vm2, %v829_v20  ;;  %v2638_v33 = vld [vmem:[%s2854_s4] ss:$0 sm:$0xff] }
 0x172   : > { %2143 = vmatprep.mubr.msk.bf16.mxu1 %vm2371_vm1, %v2370_v17 }
 0x244   : > { %v891_v22 = vpop.f32.mrb[0].mxu1 }
 0x245   : > { %v892_v23 = vadd.f32 %v2052_v21, %v891_v22  ;;  %v2139_v24 = vpop.f32.mrb[1].mxu1 }
 0x246   : > { %v894_v25 = vpop.f32.mrb[2].mxu1 }
 0x247   : > { %v2617_v26 = vpack.c.bf16 %v892_v23, %v892_v23  ;;  %v2140_v27 = vpop.f32.mrb[3].mxu1 }
 0x249   : > { %1020 = vrot.lane.b32.xlu1 %v2617_v26, %s2372_s29  ;;  %909 = vrot.lane.b32.xlu0 %v2617_v26, %s2373_s0  ;;  %s2855_s0 = scalar_lea.vmem %s2803_s7, %s2516_s20 }
 0x24d   : > { %1022 = vrot.lane.b32.xlu0 %v2617_v26, %s2374_s30 }
 0x2bb   : > { %v910_v28 = vpop.permute.xlu0 %909  ;;  %v1021_v32 = vpop.permute.xlu1 %1020 }
 0x2bc   : > { %v916_v29 = vsel %vm911_vm3, %v910_v28, 0 }
 0x2bd   : > { %2142 = vmatpush3.bf16.xpose.msra.mxu1 %v916_v29 }
 0x2be   : > { %2153 = vmatprep.subr.bf16.mxu1 %v2370_v17 }
 0x2bf   : > { %v1023_v30 = vpop.permute.xlu0 %1022 }
 0x2c0   : > { %v1028_v31 = vsel %vm911_vm3, %v1023_v30, 0 }
 0x2c4   : > { %2144 = vmatmul.mubr.msk.bf16.vlgmr.msra.gmra.mrb[4].mxu1 %vm911_vm3, %v2617_v26 }
 0x2c5   : > { %2154 = vmatpush3.bf16.xpose.msra.mxu1 %v1028_v31  ;;  %2155 = vmatprep.mubr.msk.bf16.mxu1 %vm2371_vm1, %v2370_v17 }
 0x2c6   : > { %2165 = vmatprep.subr.bf16.mxu1 %v2370_v17 }
 0x2cc   : > { %2156 = vmatmul.mubr.msk.bf16.vlgmr.msra.gmra.mrb[8].mxu1 %vm911_vm3, %v1021_v32 }
 0x2cd   : > { %2167 = vmatprep.mubr.msk.bf16.mxu1 %vm2371_vm1, %v2370_v17  ;;  %2166 = vmatpush3.bf16.msra.mxu1 %v1135_v7 }
 0x2ce   : > { %2177 = vmatprep.subr.bf16.mxu1 %v2370_v17 }
 0x397   : > { %v952_v34 = vpop.f32.mrb[4].mxu1 }
 0x398   : > { %v953_v35 = vadd.f32 %v2638_v33, %v952_v34  ;;  %v2145_v36 = vpop.f32.mrb[5].mxu1 }
 0x399   : > { %v955_v37 = vpop.f32.mrb[6].mxu1 }
 0x39a   : > { %v2146_v38 = vpop.f32.mrb[7].mxu1  ;;  %v958_v39 = vsel %vm911_vm3, %v953_v35, -inf }
 0x39b   : > { %959 = vmax.xlane.f32.xlu1 %v958_v39 }
 0x39f   : > { %v1064_v40 = vpop.f32.mrb[8].mxu1 }
 0x3a0   : > { %v1065_v41 = vadd.f32 %v2638_v33, %v1064_v40  ;;  %v2157_v42 = vpop.f32.mrb[9].mxu1 }
 0x3a1   : > { %v1067_v43 = vpop.f32.mrb[10].mxu1 }
 0x3a2   : > { %v2158_v44 = vpop.f32.mrb[11].mxu1  ;;  %v1070_v45 = vsel %vm911_vm3, %v1065_v41, -inf }
 0x3a3   : > { %1071 = vmax.xlane.f32.xlu0 %v1070_v45 }
 0x428   : > { %v960_v46 = vpop.xlane.xlu1 %959 }
 0x429   : > { %v961_v47 = vsub.f32 %v953_v35, %v960_v46 }
 0x42b   : > { %v962_v48 = vmul.f32 1.442695, %v961_v47 }
 0x42d   : > { %2306 = vpow2.f32 %v962_v48 }
 0x430   : > { %v1072_v49 = vpop.xlane.xlu0 %1071 }
 0x431   : > { %v1073_v50 = vsub.f32 %v1065_v41, %v1072_v49 }
 0x433   : > { %v1074_v51 = vmul.f32 1.442695, %v1073_v50 }
 0x435   : > { %2308 = vpow2.f32 %v1074_v51 }
 0x437   : > { %v2307_v52 = vpop.eup %2306 }
 0x438   : > { %v964_v53 = vsel %vm911_vm3, %v2307_v52, 0.0 }
 0x439   : > { %965 = vadd.xlane.f32.xlu0 %v964_v53 }
 0x43f   : > { %v2309_v54 = vpop.eup %2308 }
 0x440   : > { %v1076_v55 = vsel %vm911_vm3, %v2309_v54, 0.0 }
 0x441   : > { %1077 = vadd.xlane.f32.xlu1 %v1076_v55 }
 0x44f   : > { %970 = vrot.lane.b32.xlu0 %v2617_v26, %s2375_s6 }
 0x452   : > { %1082 = vrot.lane.b32.xlu1 %v2617_v26, %s2376_s27  ;;  %s2858_s27 = sld [smem:[#allocation17_spill]] }
 0x453   : > { %1223 = vrot.lane.b32.xlu0 %v2617_v26, %s2377_s19 }
 0x456   : > { %1225 = vrot.lane.b32.xlu1 %v2617_v26, %s2378_s21 }
 0x458   : > { %s2859_s19 = scalar_lea.vmem %s2858_s27, %s2516_s20 }
 0x4c6   : > { %v966_v56 = vpop.xlane.xlu0 %965 }
 0x4c7   : > { %2310 = vrcp.f32 %v966_v56 }
 0x4ca   : > { %v971_v57 = vpop.permute.xlu0 %970 }
 0x4cb   : > { %v977_v58 = vsel %vm975_vm4, %v971_v57, 0 }
 0x4cc   : > { %2148 = vmatpush3.bf16.msra.mxu0 %v977_v58 }
 0x4cd   : > { %2159 = vmatprep.subr.bf16.mxu0 %v2370_v17 }
 0x4ce   : > { %v1078_v59 = vpop.xlane.xlu1 %1077  ;;  %v1224_v22 = vpop.permute.xlu0 %1223 }
 0x4cf   : > { %2312 = vrcp.f32 %v1078_v59 }
 0x4d1   : > { %v2311_v60 = vpop.eup %2310 }
 0x4d2   : > { %v968_v61 = vmul.f32 %v2311_v60, %v2307_v52  ;;  %v1083_v62 = vpop.permute.xlu1 %1082 }
 0x4d3   : > { %v1088_v0 = vsel %vm975_vm4, %v1083_v62, 0 }
 0x4d4   : > { %v969_v63 = vpack.c.bf16 %v968_v61, %v968_v61 }
 0x4d6   : > { %2150 = vmatmul.mubr.msk.bf16.vlgmr.msra.gmra.mrb[0].mxu0 %vm911_vm3, %v969_v63  ;;  %v1226_v13 = vpop.permute.xlu1 %1225 }
 0x4d7   : > { %2160 = vmatpush3.bf16.msra.mxu0 %v1088_v0  ;;  %2161 = vmatprep.mubr.msk.bf16.mxu0 %vm2371_vm1, %v2370_v17  ;;  %v1231_v20 = vsel %vm911_vm3, %v1226_v13, 0 }
 0x4d8   : > { %2171 = vmatprep.subr.bf16.mxu0 %v2370_v17 }
 0x4d9   : > { %v2313_v1 = vpop.eup %2312 }
 0x4da   : > { %v1080_v2 = vmul.f32 %v2313_v1, %v2309_v54  ;;  %v899_v54 = vld [vmem:[%s2539_s22 + $0x8] sm:$0xf] }
 0x4db   : > { %v1338_v55 = vsel %vm975_vm4, %v899_v54, 0  ;;  %v2303_v54 = vld [vmem:[%s2570_s24 + $0x8] sm:$0xff]  }
 0x4dc   : > { %v1081_v3 = vpack.c.bf16 %v1080_v2, %v1080_v2 }
 0x4de   : > { %2162 = vmatmul.mubr.msk.bf16.vlgmr.msra.gmra.mrb[4].mxu0 %vm911_vm3, %v1081_v3 }
 0x4df   : > { %2173 = vmatprep.mubr.msk.bf16.mxu0 %vm2371_vm1, %v2370_v17  ;;  %2172 = vmatpush3.bf16.msra.mxu0 %v1181_v5 }
 0x4e0   : > { %2183 = vmatprep.subr.bf16.mxu0 %v2370_v17 }
 0x5a9   : > { %v1013_v8 = vpop.f32.mrb[0].mxu0 }
 0x5aa   : > { %v1019_v9 = vpack.c.bf16 %v1013_v8, %v1013_v8  ;;  %v2151_v10 = vpop.f32.mrb[1].mxu0 }
 0x5ab   : > { %v1016_v11 = vpop.f32.mrb[2].mxu0 }
 0x5ac   : > { %v2152_v12 = vpop.f32.mrb[3].mxu0  ;;  %2174 = vmatmul.mubr.msk.bf16.vlgmr.msra.gmra.mrb[8].mxu0 %vm911_vm3, %v1019_v9  ;;  %v900_v9 = vld [vmem:[%s2539_s22 + $0xc] sm:$0xf]  ;;  %s2861_s22 = sld [smem:[#allocation3_spill]] }
 0x5ad   : > { %2185 = vmatprep.mubr.msk.bf16.mxu0 %vm2371_vm1, %v2370_v17  ;;  %v1496_v10 = vsel %vm975_vm4, %v900_v9, 0 }
 0x5b1   : > { %v1124_v14 = vpop.f32.mrb[4].mxu0 }
 0x5b2   : > { %v1130_v15 = vpack.c.bf16 %v1124_v14, %v1124_v14  ;;  %v2163_v16 = vpop.f32.mrb[5].mxu0  ;;  %p2084_p8 = scmp.ne.s32.totalorder %s2861_s22, 1 }
 0x5b3   : > { %v1127_v18 = vpop.f32.mrb[6].mxu0  ;;  %s2862_s30 = sld [smem:[#allocation19_spill]] (!%p2084_p8)  ;;  %vm2384_vm6 = vmmov (!%p2084_p8), 0   ;;  %s2864_s18 = sld [smem:[#allocation20_spill]] (!%p2084_p8) }
 0x5b4   : > { %v2164_v21 = vpop.f32.mrb[7].mxu0  ;;  %2168 = vmatmul.mubr.msk.bf16.vlgmr.msra.gmra.mrb[12].mxu1 %vm911_vm3, %v1130_v15 }
 0x5b5   : > { %2178 = vmatpush3.bf16.xpose.msra.mxu1 %v1231_v20  ;;  %2179 = vmatprep.mubr.msk.bf16.mxu1 %vm2371_vm1, %v2370_v17 }
 0x5b6   : > { %2189 = vmatprep.subr.bf16.mxu1 %v2370_v17 }
 0x5b9   : > { %s2863_s3 = smov (!%p2084_p8), %s2862_s30 }
 0x5bc   : > { %2180 = vmatmul.mubr.msk.bf16.vlgmr.msra.gmra.mrb[16].mxu1 %vm911_vm3, %v1224_v22 }
 0x5bd   : > { %2191 = vmatprep.mubr.msk.bf16.mxu1 %vm2371_vm1, %v2370_v17  ;;  %2190 = vmatpush3.bf16.msra.mxu1 %v1338_v55  ;;  %v2304_v55 = vld [vmem:[%s2570_s24 + $0x10] sm:$0xff]  }
 0x5be   : > { %2201 = vmatprep.subr.bf16.mxu1 %v2370_v17 }
 0x67f   : > { %v1217_v23 = vpop.f32.mrb[8].mxu0 }
 0x680   : > { %v2175_v24 = vpop.f32.mrb[9].mxu0 }
 0x681   : > { %v1220_v25 = vpop.f32.mrb[10].mxu0 }
 0x682   : > { %v2176_v27 = vpop.f32.mrb[11].mxu0 }
 0x687   : > { %v1171_v28 = vpop.f32.mrb[12].mxu1 }
 0x688   : > { %v2677_v29 = vadd.f32 %v1217_v23, %v1171_v28  ;;  %v2169_v30 = vpop.f32.mrb[13].mxu1 }
 0x689   : > { %v1174_v31 = vpop.f32.mrb[14].mxu1 }
 0x68a   : > { %v2170_v32 = vpop.f32.mrb[15].mxu1  ;;  %v2069_v31 = vld [vmem:[%s2855_s0] ss:$0 sm:$0xff] }
 0x68f   : > { %v1267_v34 = vpop.f32.mrb[16].mxu1 }
 0x690   : > { %v1268_v35 = vadd.f32 %v2638_v33, %v1267_v34  ;;  %v2181_v36 = vpop.f32.mrb[17].mxu1 }
 0x691   : > { %v1270_v37 = vpop.f32.mrb[18].mxu1 }
 0x692   : > { %v2182_v38 = vpop.f32.mrb[19].mxu1  ;;  %v1273_v39 = vsel %vm911_vm3, %v1268_v35, -inf }
 0x693   : > { %1274 = vmax.xlane.f32.xlu1 %v1273_v39 }
 0x6a4   : > { %1383 = vrot.lane.b32.xlu1 %v2617_v26, %s2379_s23 }
 0x6a8   : > { %1381 = vrot.lane.b32.xlu1 %v2617_v26, %s2380_s17 }
 0x720   : > { %v1275_v40 = vpop.xlane.xlu1 %1274 }
 0x721   : > { %v1276_v41 = vsub.f32 %v1268_v35, %v1275_v40 }
 0x723   : > { %v1277_v42 = vmul.f32 1.442695, %v1276_v41 }
 0x724   : > { %v1384_v50 = vpop.permute.xlu1 %1383 }
 0x725   : > { %2314 = vpow2.f32 %v1277_v42  ;;  %v1389_v52 = vsel %vm911_vm3, %v1384_v50, 0  ;;  %v2300_v42 = vld [vmem:[%s2556_s16] sm:$0xff]  }
 0x728   : > { %v1382_v53 = vpop.permute.xlu1 %1381 }
 0x72f   : > { %v2315_v43 = vpop.eup %2314 }
 0x730   : > { %v1279_v44 = vsel %vm911_vm3, %v2315_v43, 0.0 }
 0x731   : > { %1280 = vadd.xlane.f32.xlu0 %v1279_v44 }
 0x747   : > { %1285 = vrot.lane.b32.xlu0 %v2617_v26, %s2381_s1 }
 0x7be   : > { %v1281_v45 = vpop.xlane.xlu0 %1280 }
 0x7bf   : > { %2316 = vrcp.f32 %v1281_v45 }
 0x7c2   : > { %v1286_v46 = vpop.permute.xlu0 %1285 }
 0x7c3   : > { %v1291_v47 = vsel %vm975_vm4, %v1286_v46, 0 }
 0x7c4   : > { %2184 = vmatpush3.bf16.msra.mxu0 %v1291_v47  ;;  %v2070_v47 = vld [vmem:[%s2856_s15] ss:$0 sm:$0xff] }
 0x7c5   : > { %2195 = vmatprep.subr.bf16.mxu0 %v2370_v17 }
 0x7c9   : > { %v2317_v48 = vpop.eup %2316 }
 0x7ca   : > { %v1283_v49 = vmul.f32 %v2317_v48, %v2315_v43  ;;  %v2301_v43 = vld [vmem:[%s2556_s16 + $0x8] sm:$0xff]   ;;  %s2857_s16 = scalar_lea.vmem %s2805_s9, %s2516_s20 }
 0x7cc   : > { %v1284_v51 = vpack.c.bf16 %v1283_v49, %v1283_v49  ;;  %v2071_v49 = vld [vmem:[%s2857_s16] ss:$0 sm:$0xff] }
 0x7ce   : > { %2186 = vmatmul.mubr.msk.bf16.vlgmr.msra.gmra.mrb[12].mxu0 %vm911_vm3, %v1284_v51 }
 0x7cf   : > { %2196 = vmatpush3.bf16.xpose.msra.mxu0 %v1389_v52  ;;  %2197 = vmatprep.mubr.msk.bf16.mxu0 %vm2371_vm1, %v2370_v17 }
 0x7d0   : > { %2207 = vmatprep.subr.bf16.mxu0 %v2370_v17 }
 0x7d6   : > { %2198 = vmatmul.mubr.msk.bf16.vlgmr.msra.gmra.mrb[16].mxu0 %vm911_vm3, %v1382_v53  ;;  %v2302_v53 = vld [vmem:[%s2570_s24] sm:$0xff]  }
 0x7d7   : > { %2209 = vmatprep.mubr.msk.bf16.mxu0 %vm2371_vm1, %v2370_v17  ;;  %2208 = vmatpush3.bf16.msra.mxu0 %v1496_v10 }
 0x7d8   : > { %2221 = vmatprep.subr.bf16.mxu0 %v2370_v17 }
 0x8a1   : > { %v1327_v56 = vpop.f32.mrb[12].mxu0 }
 0x8a2   : > { %v1333_v57 = vpack.c.bf16 %v1327_v56, %v1327_v56  ;;  %v2187_v58 = vpop.f32.mrb[13].mxu0  ;;  %v2305_v56 = vld [vmem:[%s2570_s24 + $0x18] sm:$0xff]  }
 0x8a3   : > { %v1330_v59 = vpop.f32.mrb[14].mxu0 }
 0x8a4   : > { %v2188_v60 = vpop.f32.mrb[15].mxu0  ;;  %2192 = vmatmul.mubr.msk.bf16.vlgmr.msra.gmra.mrb[20].mxu1 %vm911_vm3, %v1333_v57  ;;  %v2072_v57 = vld [vmem:[%s2859_s19] ss:$0 sm:$0xff] }
 0x8a5   : > { %2203 = vmatprep.mubr.msk.bf16.mxu1 %vm2371_vm1, %v2370_v17 }
 0x8a9   : > { %v1425_v61 = vpop.f32.mrb[16].mxu0 }
 0x8aa   : > { %v1426_v62 = vadd.f32 %v2638_v33, %v1425_v61  ;;  %v2199_v63 = vpop.f32.mrb[17].mxu0 }
 0x8ab   : > { %v1428_v0 = vpop.f32.mrb[18].mxu0 }
 0x8ac   : > { %v2200_v1 = vpop.f32.mrb[19].mxu0  ;;  %v1431_v2 = vsel %vm911_vm3, %v1426_v62, -inf }
 0x8ad   : > { %1432 = vmax.xlane.f32.xlu0 %v1431_v2 }
 0x8c3   : > { %1443 = vrot.lane.b32.xlu0 %v2617_v26, %s2382_s26 }
 0x93a   : > { %v1433_v3 = vpop.xlane.xlu0 %1432 }
 0x93b   : > { %v1434_v4 = vsub.f32 %v1426_v62, %v1433_v3 }
 0x93d   : > { %v1435_v5 = vmul.f32 1.442695, %v1434_v4 }
 0x93e   : > { %v1444_v6 = vpop.permute.xlu0 %1443 }
 0x93f   : > { %2318 = vpow2.f32 %v1435_v5  ;;  %v1449_v7 = vsel %vm975_vm4, %v1444_v6, 0 }
 0x940   : > { %2202 = vmatpush3.bf16.msra.mxu1 %v1449_v7 }
 0x941   : > { %2213 = vmatprep.subr.bf16.mxu1 %v2370_v17 }
 0x949   : > { %v2319_v33 = vpop.eup %2318 }
 0x94a   : > { %v1437_v8 = vsel %vm911_vm3, %v2319_v33, 0.0 }
 0x94b   : > { %1438 = vadd.xlane.f32.xlu1 %v1437_v8 }
 0x977   : > { %v1374_v26 = vpop.f32.mrb[20].mxu1 }
 0x978   : > { %v1380_v11 = vadd.f32 %v1374_v26, %v2677_v29  ;;  %v2193_v12 = vpop.f32.mrb[21].mxu1 }
 0x979   : > { %v1377_v13 = vpop.f32.mrb[22].mxu1 }
 0x97a   : > { %v2194_v14 = vpop.f32.mrb[23].mxu1 }
 0x9d8   : > { %v1439_v15 = vpop.xlane.xlu1 %1438 }
 0x9d9   : > { %2320 = vrcp.f32 %v1439_v15 }
 0x9e3   : > { %v2321_v16 = vpop.eup %2320 }
 0x9e4   : > { %v1441_v18 = vmul.f32 %v2321_v16, %v2319_v33  ;;  %v2076_v33 = vld [vmem:[%s778_s25] ss:$0 sm:$0xff] }
 0x9e6   : > { %v1442_v20 = vpack.c.bf16 %v1441_v18, %v1441_v18 }
 0x9e8   : > { %2204 = vmatmul.mubr.msk.bf16.vlgmr.msra.gmra.mrb[24].mxu1 %vm911_vm3, %v1442_v20 }
 0x9e9   : > { %2217 = vmatprep.mubr.msk.bf16.mxu1 %vm2371_vm1, %v2370_v17  ;;  %2214 = vmatpush3.bf16.msra.mxu1 %v2300_v42 }
 0x9ea   : > { %2215 = vmatprep.subr.bf16.mxu1 %v2370_v17 }
 0x9ed   : > { %2216 = vmatpush3.bf16.msra.mxu1 %v2301_v43 }
 0xabb   : > { %v1485_v21 = vpop.f32.mrb[24].mxu1 }
 0xabc   : > { %v1491_v22 = vpack.c.bf16 %v1485_v21, %v1485_v21  ;;  %v2205_v23 = vpop.f32.mrb[25].mxu1 }
 0xabd   : > { %v1488_v24 = vpop.f32.mrb[26].mxu1 }
 0xabe   : > { %v2206_v25 = vpop.f32.mrb[27].mxu1  ;;  %2210 = vmatmul.mubr.msk.bf16.vlgmr.msra.gmra.mrb[20].mxu0 %vm911_vm3, %v1491_v22 }
 0xabf   : > { %2229 = vmatprep.mubr.msk.bf16.mxu0 %vm2371_vm1, %v2370_v17  ;;  %2222 = vmatpush3.bf16.msra.mxu0 %v2302_v53  ;;  %v2082_v25 = vld [vmem:[%s781_s28] ss:$0 sm:$0xff] }
 0xac0   : > { %2223 = vmatprep.subr.bf16.mxu0 %v2370_v17 }
 0xac3   : > { %2224 = vmatpush3.bf16.msra.mxu0 %v2303_v54 }
 0xac4   : > { %2225 = vmatprep.subr.bf16.mxu0 %v2370_v17 }
 0xac7   : > { %2226 = vmatpush3.bf16.msra.mxu0 %v2304_v55 }
 0xac8   : > { %2227 = vmatprep.subr.bf16.mxu0 %v2370_v17 }
 0xacb   : > { %2228 = vmatpush3.bf16.msra.mxu0 %v2305_v56 }
 0xb91   : > { %v1532_v27 = vpop.f32.mrb[20].mxu0 }
 0xb92   : > { %v1538_v28 = vadd.f32 %v1532_v27, %v1380_v11  ;;  %v2211_v29 = vpop.f32.mrb[21].mxu0 }
 0xb93   : > { %v1535_v30 = vpop.f32.mrb[22].mxu0 }
 0xb94   : > { %v1539_v32 = vadd.f32 %v1538_v28, %v2601_v19  ;;  %v2212_v34 = vpop.f32.mrb[23].mxu0  ;;  %v2083_v28 = vld [vmem:[%s784_s10] ss:$0 sm:$0xff] }
 0xb95   : > { %v2329_v34 = vld [vmem:[%s2863_s3 + $0x8] sm:$0xff] (!%p2084_p8)  }
 0xb96   : > { %v1547_v35 = vadd.f32 %v2069_v31, %v1539_v32  ;;  %v2328_v31 = vld [vmem:[%s2862_s30] sm:$0xff] (!%p2084_p8)   ;;  %v2383_v32 = vmov (!%p2084_p8), 0.0  }
 0xb97   : > { %2233 = vmatprep.subr.bf16.mxu0 (!%p2084_p8), %v2383_v32 }
 0xb98   : > { %v1550_v36 = vsel %vm853_vm2, %v1547_v35, 0.0 }
 0xb99   : > { %1551 = vadd.xlane.f32.xlu1 %v1550_v36  ;;  %v2085_v36 = vld [vmem:[%s2864_s18] ss:$0 sm:$0xff] (!%p2084_p8) }
 0xc26   : > { %v1552_v37 = vpop.xlane.xlu1 %1551 }
 0xc27   : > { %v1554_v38 = vmul.f32 0.03125, %v1552_v37 }
 0xc29   : > { %v1555_v39 = vsub.f32 %v1547_v35, %v1554_v38 }
 0xc2b   : > { %v1556_v40 = vmul.f32 %v1555_v39, %v1555_v39 }
 0xc2d   : > { %v1557_v41 = vsel %vm853_vm2, %v1556_v40, 0.0 }
 0xc2e   : > { %1558 = vadd.xlane.f32.xlu1 %v1557_v41 }
 0xcbb   : > { %v1559_v19 = vpop.xlane.xlu1 %1558 }
 0xcbc   : > { %v1560_v44 = vmul.f32 0.03125, %v1559_v19 }
 0xcbe   : > { %v1561_v45 = vadd.f32 1e-12, %v1560_v44 }
 0xcc0   : > { %2322 = vrsqrt.f32 %v1561_v45 }
 0xcca   : > { %v2323_v46 = vpop.eup %2322 }
 0xccb   : > { %v1563_v48 = vmul.f32 %v2323_v46, %v1555_v39 }
 0xccd   : > { %v1570_v50 = vmul.f32 %v2070_v47, %v1563_v48 }
 0xccf   : > { %v1577_v51 = vadd.f32 %v2071_v49, %v1570_v50 }
 0xcd1   : > { %v1578_v52 = vpack.c.bf16 %v1577_v51, %v1577_v51 }
 0xcd3   : > { %2218 = vmatmul.mubr.msk.bf16.vlgmr.msra.gmra.mrb[28].mxu1 %vm853_vm2, %v1578_v52 }
 0xda6   : > { %v1639_v58 = vpop.f32.mrb[28].mxu1 }
 0xda7   : > { %v1640_v59 = vadd.f32 %v2072_v57, %v1639_v58  ;;  %v2219_v60 = vpop.f32.mrb[29].mxu1 }
 0xda8   : > { %v1642_v61 = vpop.f32.mrb[30].mxu1 }
 0xda9   : > { %v1645_v62 = vmul.f32 %v1640_v59, %v1640_v59  ;;  %v2220_v63 = vpop.f32.mrb[31].mxu1 }
 0xdab   : > { %v1646_v0 = vmul.f32 %v1645_v62, %v1640_v59 }
 0xdad   : > { %v1647_v1 = vmul.f32 0.044715, %v1646_v0 }
 0xdaf   : > { %v1648_v2 = vadd.f32 %v1647_v1, %v1640_v59 }
 0xdb1   : > { %v1649_v3 = vmul.f32 0.7978846, %v1648_v2 }
 0xdb3   : > { %2324 = vtanh.f32 %v1649_v3 }
 0xdbd   : > { %v2325_v17 = vpop.eup %2324 }
 0xdbe   : > { %v1651_v4 = vadd.f32 1.0, %v2325_v17 }
 0xdc0   : > { %v1652_v5 = vmul.f32 0.5, %v1651_v4 }
 0xdc2   : > { %v1653_v6 = vmul.f32 %v1652_v5, %v1640_v59 }
 0xdc4   : > { %v1654_v7 = vpack.c.bf16 %v1653_v6, %v1653_v6 }
 0xdc6   : > { %2230 = vmatmul.mubr.msk.bf16.vlgmr.msra.gmra.mrb[24].mxu0 %vm1694_vm5, %v1654_v7 }
 0xdc7   : > { %2234 = vmatpush3.bf16.msra.mxu0 (!%p2084_p8), %v2328_v31  ;;  %2237 = vmatprep.mubr.msk.bf16.mxu0 (!%p2084_p8), %vm2384_vm6, %v2383_v32 }
 0xdc8   : > { %2235 = vmatprep.subr.bf16.mxu0 (!%p2084_p8), %v2383_v32 }
 0xdcb   : > { %2236 = vmatpush3.bf16.msra.mxu0 (!%p2084_p8), %v2329_v34 }
 0xe99   : > { %v1732_v8 = vpop.f32.mrb[24].mxu0 }
 0xe9a   : > { %v1733_v9 = vadd.f32 %v2076_v33, %v1732_v8  ;;  %v2231_v10 = vpop.f32.mrb[25].mxu0 }
 0xe9b   : > { %v1735_v26 = vpop.f32.mrb[26].mxu0 }
 0xe9c   : > { %v2232_v11 = vpop.f32.mrb[27].mxu0  ;;  %v1738_v12 = vadd.f32 %v1733_v9, %v1577_v51 }
 0xe9e   : > { %v1741_v13 = vsel %vm853_vm2, %v1738_v12, 0.0 }
 0xe9f   : > { %1742 = vadd.xlane.f32.xlu1 %v1741_v13 }
 0xf2c   : > { %v1743_v14 = vpop.xlane.xlu1 %1742 }
 0xf2d   : > { %v1744_v15 = vmul.f32 0.03125, %v1743_v14 }
 0xf2f   : > { %v1745_v16 = vsub.f32 %v1738_v12, %v1744_v15 }
 0xf31   : > { %v1746_v18 = vmul.f32 %v1745_v16, %v1745_v16 }
 0xf33   : > { %v1747_v20 = vsel %vm853_vm2, %v1746_v18, 0.0 }
 0xf34   : > { %1748 = vadd.xlane.f32.xlu1 %v1747_v20 }
 0xfc1   : > { %v1749_v21 = vpop.xlane.xlu1 %1748 }
 0xfc2   : > { %v1750_v22 = vmul.f32 0.03125, %v1749_v21 }
 0xfc4   : > { %v1751_v23 = vadd.f32 1e-12, %v1750_v22 }
 0xfc6   : > { %2326 = vrsqrt.f32 %v1751_v23 }
 0xfd0   : > { %v2327_v24 = vpop.eup %2326 }
 0xfd1   : > { %v1753_v27 = vmul.f32 %v2327_v24, %v1745_v16  ;;  %1772 = sbr.rel (%p2084_p8) target bundleno = 4272 (0x10b0), region = 100 }
 0xfd3   : > { %v1760_v29 = vmul.f32 %v2082_v25, %v1753_v27 }
 0xfd5   : > { %v1767_v30 = vadd.f32 %v2083_v28, %v1760_v29 }
 0xfd7   : > { %1768 = vst.msk [vmem:[#allocation2] sm:$0xff] %vm853_vm2, %v1767_v30  ;;  %v1773_v35 = vpack.c.bf16 (!%p2084_p8), %v1767_v30, %v1767_v30 }
 0xfd9   : > { %2238 = vmatmul.mubr.msk.bf16.vlgmr.msra.gmra.mrb[0].mxu0 %vm853_vm2, %v1773_v35 }
0x10ac   : > { %v1834_v37 = vpop.f32.mrb[0].mxu0 }
0x10ad   : > { %v1835_v38 = vadd.f32 %v2085_v36, %v1834_v37  ;;  %v2239_v39 = vpop.f32.mrb[1].mxu0 }
0x10ae   : > { %v1837_v40 = vpop.f32.mrb[2].mxu0 }
0x10af   : > { %1840 = vst [vmem:[%s2583_s11] sm:$0xff] %v1835_v38  ;;  %v2240_v41 = vpop.f32.mrb[3].mxu0 }
0x10b0 PF: > { %s2865_s2 = sld [smem:[#allocation6_spill]]  ;;  %s2866_s27 = sld [smem:[#allocation4_spill]] }
0x10b1   : > { %s2867_s28 = sld [smem:[#allocation5_spill]]  ;;  %s2868_s29 = sld [smem:[#allocation7_spill]] }
0x10b2   : > { %s2869_s30 = sld [smem:[#allocation8_spill]] }
0x10b6   : > { %s28_s0 = sadd.s32 1, %s2865_s2  }
0x10b7   : > { %p25_p9 = scmp.ge.s32.totalorder %s28_s0, 6  }
0x10b9   :  { %27 = sbr.rel (!%p25_p9) target bundleno = 13 (0xd), region = 169 }

</bundles_post_ra>
